<compile_context>
chip_gen: v6e
topology: v6e:2x2x1
jax: 0.10.0
libtpu: 0.0.40
codegen_flags: <defaults>
</compile_context>

<pallas_src>
import math

import jax
import jax.numpy as jnp
from jax.experimental import pallas as pl
from jax.experimental.pallas import tpu as pltpu


def _round_up(x, m):
    return (x + m - 1) // m * m


# -----------------------------------------------------------------------------
# Single fused kernel: all LSTM layers + final fc on the last hidden state.
# Processes one batch block of BB rows per grid step (grid axis = batch blocks).
# -----------------------------------------------------------------------------
def _make_fused_lstm_kernel(num_layers, T, BB, H):
    """Ref order: x, h0, c0, (w_ih_t, w_hh_t, b) * L, w_fc, b_fc,
                  out, gates_scr[, seq_scr]."""
    n_in = 3 + 3 * num_layers + 2

    def kernel(*refs):
        x_ref, h0_ref, c0_ref = refs[0], refs[1], refs[2]
        layer_refs = [(refs[3 + 3 * l], refs[4 + 3 * l], refs[5 + 3 * l])
                      for l in range(num_layers)]
        w_fc_ref, b_fc_ref = refs[n_in - 2], refs[n_in - 1]
        out_ref = refs[n_in]
        gates_scr = refs[n_in + 1]                       # (T*BB, 4H) f32
        seq_scr = refs[n_in + 2] if num_layers > 1 else None   # (T*BB, H) bf16

        h = None
        for l in range(num_layers):
            w_ih_ref, w_hh_ref, b_ref = layer_refs[l]

            # Hoisted input projection + fused bias: one big bf16 matmul with
            # f32 accumulation, off the recurrence critical path.
            xin = x_ref[...] if l == 0 else seq_scr[...]          # bf16
            gates_scr[...] = (
                jnp.dot(xin, w_ih_ref[...],
                        preferred_element_type=jnp.float32)
                + b_ref[...])

            h = h0_ref[l]                                         # (BB, H) f32
            c = c0_ref[l]
            write_seq = l < num_layers - 1

            # Static unroll of the recurrence (T is small & static).
            for t in range(T):
                g = gates_scr[t * BB:(t + 1) * BB, :] + jnp.dot(
                    h.astype(jnp.bfloat16), w_hh_ref[...],
                    preferred_element_type=jnp.float32)
                # Packed gate layout, reordered wrapper-side to [i, f, o, g]:
                # one sigmoid (via tanh identity) over the contiguous i|f|o
                # block, one tanh over g -> 2 EUP passes per step.
                sig = 0.5 * jnp.tanh(0.5 * g[:, 0:3 * H]) + 0.5
                g_g = jnp.tanh(g[:, 3 * H:4 * H])
                i_g = sig[:, 0:H]
                f_g = sig[:, H:2 * H]
                o_g = sig[:, 2 * H:3 * H]
                c = f_g * c + i_g * g_g
                h = o_g * jnp.tanh(c)
                if write_seq:
                    seq_scr[t * BB:(t + 1) * BB, :] = h.astype(jnp.bfloat16)

        # Fused fc(out)[-1, :]: Linear(H, 1) on the final hidden state as a
        # VPU multiply + lane reduction (MXU with N=1 would be wasted).
        out_ref[...] = (jnp.sum(h * w_fc_ref[...], axis=-1, keepdims=True)
                        + b_fc_ref[...])

    return kernel


def fused_lstm_fc_forward(x3d, h0b, c0b, layer_params, w_fc, b_fc,
                          *, T, BB, nb, H):
    num_layers = len(layer_params)
    kernel = _make_fused_lstm_kernel(num_layers, T, BB, H)

    args = [x3d, h0b, c0b]
    for p in layer_params:
        args += list(p)
    args += [w_fc, b_fc]

    def batch_block_spec(a):
        # Leading axis = batch block; squeezed out of the kernel ref.
        nd = a.ndim
        return pl.BlockSpec((pl.Squeezed(),) + a.shape[1:],
                            lambda b, _nd=nd: (b,) + (0,) * (_nd - 1))

    def full_spec(a):
        nd = a.ndim
        return pl.BlockSpec(a.shape, lambda b, _nd=nd: (0,) * _nd)

    in_specs = [batch_block_spec(x3d), batch_block_spec(h0b),
                batch_block_spec(c0b)]
    in_specs += [full_spec(a) for a in args[3:]]

    scratch_shapes = [pltpu.VMEM((T * BB, 4 * H), jnp.float32)]
    if num_layers > 1:
        scratch_shapes.append(pltpu.VMEM((T * BB, H), jnp.bfloat16))

    return pl.pallas_call(
        kernel,
        out_shape=jax.ShapeDtypeStruct((nb, BB, 1), jnp.float32),
        grid_spec=pltpu.PrefetchScalarGridSpec(
            num_scalar_prefetch=0,
            grid=(nb,),
            in_specs=in_specs,
            out_specs=pl.BlockSpec((pl.Squeezed(), BB, 1),
                                   lambda b: (b, 0, 0)),
            scratch_shapes=scratch_shapes,
        ),
        compiler_params=pltpu.CompilerParams(
            dimension_semantics=("parallel",),        # v7x: shard batch blocks
            vmem_limit_bytes=32 * 1024 * 1024),
    )(*args)


# -----------------------------------------------------------------------------
# Model wrapper: PyTorch-style uniform init + packed / reordered / bf16 weights.
# All padding, transposing and gate reordering is wrapper-side layout plumbing.
# -----------------------------------------------------------------------------
class LstmModelPallas:
    def __init__(self, input_size, hidden_size, num_layers, key):
        self.input_size = input_size
        self.hidden_size = hidden_size
        self.num_layers = num_layers

        H = hidden_size
        k = 1.0 / math.sqrt(H)
        Dp = _round_up(input_size, 8)          # pad K of layer-0 matmul to 8
        self.Dp = Dp

        def reorder_gates(w):
            # PyTorch gate order along the 4H axis is [i, f, g, o];
            # repack to [i, f, o, g] so the sigmoid gates are contiguous.
            i, f, g, o = jnp.split(w, 4, axis=0)
            return jnp.concatenate([i, f, o, g], axis=0)

        self.layer_params = []
        for layer in range(num_layers):
            d_in = input_size if layer == 0 else H
            key, k1, k2, k3, k4 = jax.random.split(key, 5)
            w_ih = jax.random.uniform(k1, (4 * H, d_in), jnp.float32, -k, k)
            w_hh = jax.random.uniform(k2, (4 * H, H), jnp.float32, -k, k)
            b_ih = jax.random.uniform(k3, (4 * H,), jnp.float32, -k, k)
            b_hh = jax.random.uniform(k4, (4 * H,), jnp.float32, -k, k)

            # Pre-transpose (kernel does x @ W), reorder gates, pad K, bf16.
            w_ih_t = reorder_gates(w_ih).T                       # (d_in, 4H)
            if layer == 0 and Dp != d_in:
                w_ih_t = jnp.pad(w_ih_t, ((0, Dp - d_in), (0, 0)))
            w_hh_t = reorder_gates(w_hh).T                       # (H, 4H)
            b = reorder_gates(b_ih + b_hh).reshape(1, 4 * H)     # combined bias
            self.layer_params.append((w_ih_t.astype(jnp.bfloat16),
                                      w_hh_t.astype(jnp.bfloat16),
                                      b))

        key, k5, k6 = jax.random.split(key, 3)
        self.w_fc = jax.random.uniform(k5, (1, H), jnp.float32, -k, k)
        self.b_fc = jax.random.uniform(k6, (1, 1), jnp.float32, -k, k)

    def __call__(self, x, rng_key):
        # x: (T, B, input_size).  h0/c0 ~ N(0,1) as in the PyTorch forward.
        T, B, D = x.shape
        H, Dp, L = self.hidden_size, self.Dp, self.num_layers

        BB = min(_round_up(B, 8), 128)   # batch rows per grid step / TC
        Bp = _round_up(B, BB)
        nb = Bp // BB

        kh, kc = jax.random.split(rng_key)
        h0 = jax.random.normal(kh, (L, B, H), jnp.float32)
        c0 = jax.random.normal(kc, (L, B, H), jnp.float32)
        h0p = jnp.pad(h0, ((0, 0), (0, Bp - B), (0, 0)))
        c0p = jnp.pad(c0, ((0, 0), (0, Bp - B), (0, 0)))
        # (L, Bp, H) -> (nb, L, BB, H): batch blocks leading for the grid.
        h0b = h0p.reshape(L, nb, BB, H).transpose(1, 0, 2, 3)
        c0b = c0p.reshape(L, nb, BB, H).transpose(1, 0, 2, 3)

        # (T, Bp, Dp) bf16 -> (nb, T*BB, Dp): flat (time, batch-block) rows so
        # the kernel never reshapes.
        xp = jnp.pad(x, ((0, 0), (0, Bp - B), (0, Dp - D))).astype(jnp.bfloat16)
        x3d = (xp.reshape(T, nb, BB, Dp)
                 .transpose(1, 0, 2, 3)
                 .reshape(nb, T * BB, Dp))

        out = fused_lstm_fc_forward(
            x3d, h0b, c0b, self.layer_params, self.w_fc, self.b_fc,
            T=T, BB=BB, nb=nb, H=H)
        # Padded batch rows carry bounded garbage (bias only); slice them off.
        return out.reshape(Bp, 1)[:B]          # (B, 1)  ==  fc(out)[-1, :]


if __name__ == "__main__":
    input_size = 4
    hidden_size = 32
    num_layers = 2
    seq_len = 8
    batch = 2

    key = jax.random.PRNGKey(0)
    key, kparam, kx, kstate = jax.random.split(key, 4)

    model = LstmModelPallas(input_size, hidden_size, num_layers, kparam)
    x = jax.random.normal(kx, (seq_len, batch, input_size), jnp.float32)

    out = model(x, kstate)
    out = jax.block_until_ready(out)
    assert out.shape == (batch, 1)
    print("KERNEL_OK")
</pallas_src>

<mosaic_0001>
module attributes {stable_mosaic.version = 11 : i64} {
  func.func @kernel(%arg0: i32, %arg1: memref<1x64x8xbf16, #tpu.memory_space<vmem>>, %arg2: memref<1x2x8x32xf32, #tpu.memory_space<vmem>>, %arg3: memref<1x2x8x32xf32, #tpu.memory_space<vmem>>, %arg4: memref<8x128xbf16, #tpu.memory_space<vmem>>, %arg5: memref<32x128xbf16, #tpu.memory_space<vmem>>, %arg6: memref<1x128xf32, #tpu.memory_space<vmem>>, %arg7: memref<32x128xbf16, #tpu.memory_space<vmem>>, %arg8: memref<32x128xbf16, #tpu.memory_space<vmem>>, %arg9: memref<1x128xf32, #tpu.memory_space<vmem>>, %arg10: memref<1x32xf32, #tpu.memory_space<vmem>>, %arg11: memref<1x1xf32, #tpu.memory_space<vmem>>, %arg12: memref<1x8x1xf32, #tpu.memory_space<vmem>>, %arg13: memref<64x128xf32, #tpu.memory_space<vmem>>, %arg14: memref<64x32xbf16, #tpu.memory_space<vmem>>) attributes {dimension_semantics = [#tpu.dimension_semantics<parallel>], iteration_bounds = array<i64: 1>, scalar_prefetch = 0 : i64, scratch_operands = 2 : i64, tpu.core_type = #tpu.core_type<tc>, window_params = [{transform_indices = @transform_0, window_bounds = array<i64: 1, 64, 8>}, {transform_indices = @transform_1, window_bounds = array<i64: 1, 2, 8, 32>}, {transform_indices = @transform_2, window_bounds = array<i64: 1, 2, 8, 32>}, {pipeline_mode = #tpu.pipeline_mode<synchronous>, transform_indices = @transform_3, window_bounds = array<i64: 8, 128>}, {pipeline_mode = #tpu.pipeline_mode<synchronous>, transform_indices = @transform_4, window_bounds = array<i64: 32, 128>}, {pipeline_mode = #tpu.pipeline_mode<synchronous>, transform_indices = @transform_5, window_bounds = array<i64: 1, 128>}, {pipeline_mode = #tpu.pipeline_mode<synchronous>, transform_indices = @transform_6, window_bounds = array<i64: 32, 128>}, {pipeline_mode = #tpu.pipeline_mode<synchronous>, transform_indices = @transform_7, window_bounds = array<i64: 32, 128>}, {pipeline_mode = #tpu.pipeline_mode<synchronous>, transform_indices = @transform_8, window_bounds = array<i64: 1, 128>}, {pipeline_mode = #tpu.pipeline_mode<synchronous>, transform_indices = @transform_9, window_bounds = array<i64: 1, 32>}, {pipeline_mode = #tpu.pipeline_mode<synchronous>, transform_indices = @transform_10, window_bounds = array<i64: 1, 1>}, {transform_indices = @transform_11, window_bounds = array<i64: 1, 8, 1>}]} {
    %c0 = arith.constant 0 : index
    %c0_0 = arith.constant 0 : index
    %c0_1 = arith.constant 0 : index
    %0 = vector.load %arg1[%c0, %c0_0, %c0_1] : memref<1x64x8xbf16, #tpu.memory_space<vmem>>, vector<1x64x8xbf16>
    %1 = vector.shape_cast %0 : vector<1x64x8xbf16> to vector<64x8xbf16>
    %c0_2 = arith.constant 0 : index
    %c0_3 = arith.constant 0 : index
    %2 = vector.load %arg4[%c0_2, %c0_3] : memref<8x128xbf16, #tpu.memory_space<vmem>>, vector<8x128xbf16>
    %cst = arith.constant dense<0.000000e+00> : vector<64x128xf32>
    %3 = tpu.matmul %1, %2, %cst {dimension_numbers = #tpu.dot_dimension_numbers<[1], [0], [0], [1], [0, 0, 1, 1], [], []>} : vector<64x8xbf16>, vector<8x128xbf16>, vector<64x128xf32> -> vector<64x128xf32>
    %c0_4 = arith.constant 0 : index
    %c0_5 = arith.constant 0 : index
    %4 = vector.load %arg6[%c0_4, %c0_5] : memref<1x128xf32, #tpu.memory_space<vmem>>, vector<1x128xf32>
    %5 = vector.broadcast %4 : vector<1x128xf32> to vector<64x128xf32>
    %6 = arith.addf %3, %5 : vector<64x128xf32>
    %c0_6 = arith.constant 0 : index
    %c0_7 = arith.constant 0 : index
    %7 = vector.load %arg13[%c0_6, %c0_7] : memref<64x128xf32, #tpu.memory_space<vmem>>, vector<64x128xf32>
    tpu.vector_store %arg13[%c0_6, %c0_7], %6 {strides = array<i32>} : memref<64x128xf32, #tpu.memory_space<vmem>>, vector<64x128xf32>,
    %c0_8 = arith.constant 0 : index
    %c0_9 = arith.constant 0 : index
    %c0_10 = arith.constant 0 : index
    %c0_11 = arith.constant 0 : index
    %8 = vector.load %arg2[%c0_8, %c0_9, %c0_10, %c0_11] : memref<1x2x8x32xf32, #tpu.memory_space<vmem>>, vector<1x1x8x32xf32>
    %9 = vector.shape_cast %8 : vector<1x1x8x32xf32> to vector<8x32xf32>
    %c0_12 = arith.constant 0 : index
    %c0_13 = arith.constant 0 : index
    %c0_14 = arith.constant 0 : index
    %c0_15 = arith.constant 0 : index
    %10 = vector.load %arg3[%c0_12, %c0_13, %c0_14, %c0_15] : memref<1x2x8x32xf32, #tpu.memory_space<vmem>>, vector<1x1x8x32xf32>
    %11 = vector.shape_cast %10 : vector<1x1x8x32xf32> to vector<8x32xf32>
    %c0_16 = arith.constant 0 : index
    %c0_17 = arith.constant 0 : index
    %12 = vector.load %arg13[%c0_16, %c0_17] : memref<64x128xf32, #tpu.memory_space<vmem>>, vector<8x128xf32>
    %13 = arith.truncf %9 : vector<8x32xf32> to vector<8x32xbf16>
    %c0_18 = arith.constant 0 : index
    %c0_19 = arith.constant 0 : index
    %14 = vector.load %arg5[%c0_18, %c0_19] : memref<32x128xbf16, #tpu.memory_space<vmem>>, vector<32x128xbf16>
    %cst_20 = arith.constant dense<0.000000e+00> : vector<8x128xf32>
    %15 = tpu.matmul %13, %14, %cst_20 {dimension_numbers = #tpu.dot_dimension_numbers<[1], [0], [0], [1], [0, 0, 1, 1], [], []>} : vector<8x32xbf16>, vector<32x128xbf16>, vector<8x128xf32> -> vector<8x128xf32>
    %16 = arith.addf %12, %15 : vector<8x128xf32>
    %17 = vector.extract_strided_slice %16 {offsets = [0, 0], sizes = [8, 96], strides = [1, 1]} : vector<8x128xf32> to vector<8x96xf32>
    %cst_21 = arith.constant 5.000000e-01 : f32
    %18 = vector.broadcast %cst_21 : f32 to vector<8x96xf32>
    %19 = arith.mulf %18, %17 : vector<8x96xf32>
    %20 = math.tanh %19 : vector<8x96xf32>
    %cst_22 = arith.constant 5.000000e-01 : f32
    %21 = vector.broadcast %cst_22 : f32 to vector<8x96xf32>
    %22 = arith.mulf %21, %20 : vector<8x96xf32>
    %cst_23 = arith.constant 5.000000e-01 : f32
    %23 = vector.broadcast %cst_23 : f32 to vector<8x96xf32>
    %24 = arith.addf %22, %23 : vector<8x96xf32>
    %25 = vector.extract_strided_slice %16 {offsets = [0, 96], sizes = [8, 32], strides = [1, 1]} : vector<8x128xf32> to vector<8x32xf32>
    %26 = math.tanh %25 : vector<8x32xf32>
    %27 = vector.extract_strided_slice %24 {offsets = [0, 0], sizes = [8, 32], strides = [1, 1]} : vector<8x96xf32> to vector<8x32xf32>
    %28 = vector.extract_strided_slice %24 {offsets = [0, 32], sizes = [8, 32], strides = [1, 1]} : vector<8x96xf32> to vector<8x32xf32>
    %29 = vector.extract_strided_slice %24 {offsets = [0, 64], sizes = [8, 32], strides = [1, 1]} : vector<8x96xf32> to vector<8x32xf32>
    %30 = arith.mulf %28, %11 : vector<8x32xf32>
    %31 = arith.mulf %27, %26 : vector<8x32xf32>
    %32 = arith.addf %30, %31 : vector<8x32xf32>
    %33 = math.tanh %32 : vector<8x32xf32>
    %34 = arith.mulf %29, %33 : vector<8x32xf32>
    %35 = arith.truncf %34 : vector<8x32xf32> to vector<8x32xbf16>
    %c0_24 = arith.constant 0 : index
    %c0_25 = arith.constant 0 : index
    %36 = vector.load %arg14[%c0_24, %c0_25] : memref<64x32xbf16, #tpu.memory_space<vmem>>, vector<8x32xbf16>
    tpu.vector_store %arg14[%c0_24, %c0_25], %35 {strides = array<i32>} : memref<64x32xbf16, #tpu.memory_space<vmem>>, vector<8x32xbf16>,
    %c8 = arith.constant 8 : index
    %c0_26 = arith.constant 0 : index
    %37 = vector.load %arg13[%c8, %c0_26] : memref<64x128xf32, #tpu.memory_space<vmem>>, vector<8x128xf32>
    %38 = arith.truncf %34 : vector<8x32xf32> to vector<8x32xbf16>
    %c0_27 = arith.constant 0 : index
    %c0_28 = arith.constant 0 : index
    %39 = vector.load %arg5[%c0_27, %c0_28] : memref<32x128xbf16, #tpu.memory_space<vmem>>, vector<32x128xbf16>
    %cst_29 = arith.constant dense<0.000000e+00> : vector<8x128xf32>
    %40 = tpu.matmul %38, %39, %cst_29 {dimension_numbers = #tpu.dot_dimension_numbers<[1], [0], [0], [1], [0, 0, 1, 1], [], []>} : vector<8x32xbf16>, vector<32x128xbf16>, vector<8x128xf32> -> vector<8x128xf32>
    %41 = arith.addf %37, %40 : vector<8x128xf32>
    %42 = vector.extract_strided_slice %41 {offsets = [0, 0], sizes = [8, 96], strides = [1, 1]} : vector<8x128xf32> to vector<8x96xf32>
    %cst_30 = arith.constant 5.000000e-01 : f32
    %43 = vector.broadcast %cst_30 : f32 to vector<8x96xf32>
    %44 = arith.mulf %43, %42 : vector<8x96xf32>
    %45 = math.tanh %44 : vector<8x96xf32>
    %cst_31 = arith.constant 5.000000e-01 : f32
    %46 = vector.broadcast %cst_31 : f32 to vector<8x96xf32>
    %47 = arith.mulf %46, %45 : vector<8x96xf32>
    %cst_32 = arith.constant 5.000000e-01 : f32
    %48 = vector.broadcast %cst_32 : f32 to vector<8x96xf32>
    %49 = arith.addf %47, %48 : vector<8x96xf32>
    %50 = vector.extract_strided_slice %41 {offsets = [0, 96], sizes = [8, 32], strides = [1, 1]} : vector<8x128xf32> to vector<8x32xf32>
    %51 = math.tanh %50 : vector<8x32xf32>
    %52 = vector.extract_strided_slice %49 {offsets = [0, 0], sizes = [8, 32], strides = [1, 1]} : vector<8x96xf32> to vector<8x32xf32>
    %53 = vector.extract_strided_slice %49 {offsets = [0, 32], sizes = [8, 32], strides = [1, 1]} : vector<8x96xf32> to vector<8x32xf32>
    %54 = vector.extract_strided_slice %49 {offsets = [0, 64], sizes = [8, 32], strides = [1, 1]} : vector<8x96xf32> to vector<8x32xf32>
    %55 = arith.mulf %53, %32 : vector<8x32xf32>
    %56 = arith.mulf %52, %51 : vector<8x32xf32>
    %57 = arith.addf %55, %56 : vector<8x32xf32>
    %58 = math.tanh %57 : vector<8x32xf32>
    %59 = arith.mulf %54, %58 : vector<8x32xf32>
    %60 = arith.truncf %59 : vector<8x32xf32> to vector<8x32xbf16>
    %c8_33 = arith.constant 8 : index
    %c0_34 = arith.constant 0 : index
    %61 = vector.load %arg14[%c8_33, %c0_34] : memref<64x32xbf16, #tpu.memory_space<vmem>>, vector<8x32xbf16>
    tpu.vector_store %arg14[%c8_33, %c0_34], %60 {strides = array<i32>} : memref<64x32xbf16, #tpu.memory_space<vmem>>, vector<8x32xbf16>,
    %c16 = arith.constant 16 : index
    %c0_35 = arith.constant 0 : index
    %62 = vector.load %arg13[%c16, %c0_35] : memref<64x128xf32, #tpu.memory_space<vmem>>, vector<8x128xf32>
    %63 = arith.truncf %59 : vector<8x32xf32> to vector<8x32xbf16>
    %c0_36 = arith.constant 0 : index
    %c0_37 = arith.constant 0 : index
    %64 = vector.load %arg5[%c0_36, %c0_37] : memref<32x128xbf16, #tpu.memory_space<vmem>>, vector<32x128xbf16>
    %cst_38 = arith.constant dense<0.000000e+00> : vector<8x128xf32>
    %65 = tpu.matmul %63, %64, %cst_38 {dimension_numbers = #tpu.dot_dimension_numbers<[1], [0], [0], [1], [0, 0, 1, 1], [], []>} : vector<8x32xbf16>, vector<32x128xbf16>, vector<8x128xf32> -> vector<8x128xf32>
    %66 = arith.addf %62, %65 : vector<8x128xf32>
    %67 = vector.extract_strided_slice %66 {offsets = [0, 0], sizes = [8, 96], strides = [1, 1]} : vector<8x128xf32> to vector<8x96xf32>
    %cst_39 = arith.constant 5.000000e-01 : f32
    %68 = vector.broadcast %cst_39 : f32 to vector<8x96xf32>
    %69 = arith.mulf %68, %67 : vector<8x96xf32>
    %70 = math.tanh %69 : vector<8x96xf32>
    %cst_40 = arith.constant 5.000000e-01 : f32
    %71 = vector.broadcast %cst_40 : f32 to vector<8x96xf32>
    %72 = arith.mulf %71, %70 : vector<8x96xf32>
    %cst_41 = arith.constant 5.000000e-01 : f32
    %73 = vector.broadcast %cst_41 : f32 to vector<8x96xf32>
    %74 = arith.addf %72, %73 : vector<8x96xf32>
    %75 = vector.extract_strided_slice %66 {offsets = [0, 96], sizes = [8, 32], strides = [1, 1]} : vector<8x128xf32> to vector<8x32xf32>
    %76 = math.tanh %75 : vector<8x32xf32>
    %77 = vector.extract_strided_slice %74 {offsets = [0, 0], sizes = [8, 32], strides = [1, 1]} : vector<8x96xf32> to vector<8x32xf32>
    %78 = vector.extract_strided_slice %74 {offsets = [0, 32], sizes = [8, 32], strides = [1, 1]} : vector<8x96xf32> to vector<8x32xf32>
    %79 = vector.extract_strided_slice %74 {offsets = [0, 64], sizes = [8, 32], strides = [1, 1]} : vector<8x96xf32> to vector<8x32xf32>
    %80 = arith.mulf %78, %57 : vector<8x32xf32>
    %81 = arith.mulf %77, %76 : vector<8x32xf32>
    %82 = arith.addf %80, %81 : vector<8x32xf32>
    %83 = math.tanh %82 : vector<8x32xf32>
    %84 = arith.mulf %79, %83 : vector<8x32xf32>
    %85 = arith.truncf %84 : vector<8x32xf32> to vector<8x32xbf16>
    %c16_42 = arith.constant 16 : index
    %c0_43 = arith.constant 0 : index
    %86 = vector.load %arg14[%c16_42, %c0_43] : memref<64x32xbf16, #tpu.memory_space<vmem>>, vector<8x32xbf16>
    tpu.vector_store %arg14[%c16_42, %c0_43], %85 {strides = array<i32>} : memref<64x32xbf16, #tpu.memory_space<vmem>>, vector<8x32xbf16>,
    %c24 = arith.constant 24 : index
    %c0_44 = arith.constant 0 : index
    %87 = vector.load %arg13[%c24, %c0_44] : memref<64x128xf32, #tpu.memory_space<vmem>>, vector<8x128xf32>
    %88 = arith.truncf %84 : vector<8x32xf32> to vector<8x32xbf16>
    %c0_45 = arith.constant 0 : index
    %c0_46 = arith.constant 0 : index
    %89 = vector.load %arg5[%c0_45, %c0_46] : memref<32x128xbf16, #tpu.memory_space<vmem>>, vector<32x128xbf16>
    %cst_47 = arith.constant dense<0.000000e+00> : vector<8x128xf32>
    %90 = tpu.matmul %88, %89, %cst_47 {dimension_numbers = #tpu.dot_dimension_numbers<[1], [0], [0], [1], [0, 0, 1, 1], [], []>} : vector<8x32xbf16>, vector<32x128xbf16>, vector<8x128xf32> -> vector<8x128xf32>
    %91 = arith.addf %87, %90 : vector<8x128xf32>
    %92 = vector.extract_strided_slice %91 {offsets = [0, 0], sizes = [8, 96], strides = [1, 1]} : vector<8x128xf32> to vector<8x96xf32>
    %cst_48 = arith.constant 5.000000e-01 : f32
    %93 = vector.broadcast %cst_48 : f32 to vector<8x96xf32>
    %94 = arith.mulf %93, %92 : vector<8x96xf32>
    %95 = math.tanh %94 : vector<8x96xf32>
    %cst_49 = arith.constant 5.000000e-01 : f32
    %96 = vector.broadcast %cst_49 : f32 to vector<8x96xf32>
    %97 = arith.mulf %96, %95 : vector<8x96xf32>
    %cst_50 = arith.constant 5.000000e-01 : f32
    %98 = vector.broadcast %cst_50 : f32 to vector<8x96xf32>
    %99 = arith.addf %97, %98 : vector<8x96xf32>
    %100 = vector.extract_strided_slice %91 {offsets = [0, 96], sizes = [8, 32], strides = [1, 1]} : vector<8x128xf32> to vector<8x32xf32>
    %101 = math.tanh %100 : vector<8x32xf32>
    %102 = vector.extract_strided_slice %99 {offsets = [0, 0], sizes = [8, 32], strides = [1, 1]} : vector<8x96xf32> to vector<8x32xf32>
    %103 = vector.extract_strided_slice %99 {offsets = [0, 32], sizes = [8, 32], strides = [1, 1]} : vector<8x96xf32> to vector<8x32xf32>
    %104 = vector.extract_strided_slice %99 {offsets = [0, 64], sizes = [8, 32], strides = [1, 1]} : vector<8x96xf32> to vector<8x32xf32>
    %105 = arith.mulf %103, %82 : vector<8x32xf32>
    %106 = arith.mulf %102, %101 : vector<8x32xf32>
    %107 = arith.addf %105, %106 : vector<8x32xf32>
    %108 = math.tanh %107 : vector<8x32xf32>
    %109 = arith.mulf %104, %108 : vector<8x32xf32>
    %110 = arith.truncf %109 : vector<8x32xf32> to vector<8x32xbf16>
    %c24_51 = arith.constant 24 : index
    %c0_52 = arith.constant 0 : index
    %111 = vector.load %arg14[%c24_51, %c0_52] : memref<64x32xbf16, #tpu.memory_space<vmem>>, vector<8x32xbf16>
    tpu.vector_store %arg14[%c24_51, %c0_52], %110 {strides = array<i32>} : memref<64x32xbf16, #tpu.memory_space<vmem>>, vector<8x32xbf16>,
    %c32 = arith.constant 32 : index
    %c0_53 = arith.constant 0 : index
    %112 = vector.load %arg13[%c32, %c0_53] : memref<64x128xf32, #tpu.memory_space<vmem>>, vector<8x128xf32>
    %113 = arith.truncf %109 : vector<8x32xf32> to vector<8x32xbf16>
    %c0_54 = arith.constant 0 : index
    %c0_55 = arith.constant 0 : index
    %114 = vector.load %arg5[%c0_54, %c0_55] : memref<32x128xbf16, #tpu.memory_space<vmem>>, vector<32x128xbf16>
    %cst_56 = arith.constant dense<0.000000e+00> : vector<8x128xf32>
    %115 = tpu.matmul %113, %114, %cst_56 {dimension_numbers = #tpu.dot_dimension_numbers<[1], [0], [0], [1], [0, 0, 1, 1], [], []>} : vector<8x32xbf16>, vector<32x128xbf16>, vector<8x128xf32> -> vector<8x128xf32>
    %116 = arith.addf %112, %115 : vector<8x128xf32>
    %117 = vector.extract_strided_slice %116 {offsets = [0, 0], sizes = [8, 96], strides = [1, 1]} : vector<8x128xf32> to vector<8x96xf32>
    %cst_57 = arith.constant 5.000000e-01 : f32
    %118 = vector.broadcast %cst_57 : f32 to vector<8x96xf32>
    %119 = arith.mulf %118, %117 : vector<8x96xf32>
    %120 = math.tanh %119 : vector<8x96xf32>
    %cst_58 = arith.constant 5.000000e-01 : f32
    %121 = vector.broadcast %cst_58 : f32 to vector<8x96xf32>
    %122 = arith.mulf %121, %120 : vector<8x96xf32>
    %cst_59 = arith.constant 5.000000e-01 : f32
    %123 = vector.broadcast %cst_59 : f32 to vector<8x96xf32>
    %124 = arith.addf %122, %123 : vector<8x96xf32>
    %125 = vector.extract_strided_slice %116 {offsets = [0, 96], sizes = [8, 32], strides = [1, 1]} : vector<8x128xf32> to vector<8x32xf32>
    %126 = math.tanh %125 : vector<8x32xf32>
    %127 = vector.extract_strided_slice %124 {offsets = [0, 0], sizes = [8, 32], strides = [1, 1]} : vector<8x96xf32> to vector<8x32xf32>
    %128 = vector.extract_strided_slice %124 {offsets = [0, 32], sizes = [8, 32], strides = [1, 1]} : vector<8x96xf32> to vector<8x32xf32>
    %129 = vector.extract_strided_slice %124 {offsets = [0, 64], sizes = [8, 32], strides = [1, 1]} : vector<8x96xf32> to vector<8x32xf32>
    %130 = arith.mulf %128, %107 : vector<8x32xf32>
    %131 = arith.mulf %127, %126 : vector<8x32xf32>
    %132 = arith.addf %130, %131 : vector<8x32xf32>
    %133 = math.tanh %132 : vector<8x32xf32>
    %134 = arith.mulf %129, %133 : vector<8x32xf32>
    %135 = arith.truncf %134 : vector<8x32xf32> to vector<8x32xbf16>
    %c32_60 = arith.constant 32 : index
    %c0_61 = arith.constant 0 : index
    %136 = vector.load %arg14[%c32_60, %c0_61] : memref<64x32xbf16, #tpu.memory_space<vmem>>, vector<8x32xbf16>
    tpu.vector_store %arg14[%c32_60, %c0_61], %135 {strides = array<i32>} : memref<64x32xbf16, #tpu.memory_space<vmem>>, vector<8x32xbf16>,
    %c40 = arith.constant 40 : index
    %c0_62 = arith.constant 0 : index
    %137 = vector.load %arg13[%c40, %c0_62] : memref<64x128xf32, #tpu.memory_space<vmem>>, vector<8x128xf32>
    %138 = arith.truncf %134 : vector<8x32xf32> to vector<8x32xbf16>
    %c0_63 = arith.constant 0 : index
    %c0_64 = arith.constant 0 : index
    %139 = vector.load %arg5[%c0_63, %c0_64] : memref<32x128xbf16, #tpu.memory_space<vmem>>, vector<32x128xbf16>
    %cst_65 = arith.constant dense<0.000000e+00> : vector<8x128xf32>
    %140 = tpu.matmul %138, %139, %cst_65 {dimension_numbers = #tpu.dot_dimension_numbers<[1], [0], [0], [1], [0, 0, 1, 1], [], []>} : vector<8x32xbf16>, vector<32x128xbf16>, vector<8x128xf32> -> vector<8x128xf32>
    %141 = arith.addf %137, %140 : vector<8x128xf32>
    %142 = vector.extract_strided_slice %141 {offsets = [0, 0], sizes = [8, 96], strides = [1, 1]} : vector<8x128xf32> to vector<8x96xf32>
    %cst_66 = arith.constant 5.000000e-01 : f32
    %143 = vector.broadcast %cst_66 : f32 to vector<8x96xf32>
    %144 = arith.mulf %143, %142 : vector<8x96xf32>
    %145 = math.tanh %144 : vector<8x96xf32>
    %cst_67 = arith.constant 5.000000e-01 : f32
    %146 = vector.broadcast %cst_67 : f32 to vector<8x96xf32>
    %147 = arith.mulf %146, %145 : vector<8x96xf32>
    %cst_68 = arith.constant 5.000000e-01 : f32
    %148 = vector.broadcast %cst_68 : f32 to vector<8x96xf32>
    %149 = arith.addf %147, %148 : vector<8x96xf32>
    %150 = vector.extract_strided_slice %141 {offsets = [0, 96], sizes = [8, 32], strides = [1, 1]} : vector<8x128xf32> to vector<8x32xf32>
    %151 = math.tanh %150 : vector<8x32xf32>
    %152 = vector.extract_strided_slice %149 {offsets = [0, 0], sizes = [8, 32], strides = [1, 1]} : vector<8x96xf32> to vector<8x32xf32>
    %153 = vector.extract_strided_slice %149 {offsets = [0, 32], sizes = [8, 32], strides = [1, 1]} : vector<8x96xf32> to vector<8x32xf32>
    %154 = vector.extract_strided_slice %149 {offsets = [0, 64], sizes = [8, 32], strides = [1, 1]} : vector<8x96xf32> to vector<8x32xf32>
    %155 = arith.mulf %153, %132 : vector<8x32xf32>
    %156 = arith.mulf %152, %151 : vector<8x32xf32>
    %157 = arith.addf %155, %156 : vector<8x32xf32>
    %158 = math.tanh %157 : vector<8x32xf32>
    %159 = arith.mulf %154, %158 : vector<8x32xf32>
    %160 = arith.truncf %159 : vector<8x32xf32> to vector<8x32xbf16>
    %c40_69 = arith.constant 40 : index
    %c0_70 = arith.constant 0 : index
    %161 = vector.load %arg14[%c40_69, %c0_70] : memref<64x32xbf16, #tpu.memory_space<vmem>>, vector<8x32xbf16>
    tpu.vector_store %arg14[%c40_69, %c0_70], %160 {strides = array<i32>} : memref<64x32xbf16, #tpu.memory_space<vmem>>, vector<8x32xbf16>,
    %c48 = arith.constant 48 : index
    %c0_71 = arith.constant 0 : index
    %162 = vector.load %arg13[%c48, %c0_71] : memref<64x128xf32, #tpu.memory_space<vmem>>, vector<8x128xf32>
    %163 = arith.truncf %159 : vector<8x32xf32> to vector<8x32xbf16>
    %c0_72 = arith.constant 0 : index
    %c0_73 = arith.constant 0 : index
    %164 = vector.load %arg5[%c0_72, %c0_73] : memref<32x128xbf16, #tpu.memory_space<vmem>>, vector<32x128xbf16>
    %cst_74 = arith.constant dense<0.000000e+00> : vector<8x128xf32>
    %165 = tpu.matmul %163, %164, %cst_74 {dimension_numbers = #tpu.dot_dimension_numbers<[1], [0], [0], [1], [0, 0, 1, 1], [], []>} : vector<8x32xbf16>, vector<32x128xbf16>, vector<8x128xf32> -> vector<8x128xf32>
    %166 = arith.addf %162, %165 : vector<8x128xf32>
    %167 = vector.extract_strided_slice %166 {offsets = [0, 0], sizes = [8, 96], strides = [1, 1]} : vector<8x128xf32> to vector<8x96xf32>
    %cst_75 = arith.constant 5.000000e-01 : f32
    %168 = vector.broadcast %cst_75 : f32 to vector<8x96xf32>
    %169 = arith.mulf %168, %167 : vector<8x96xf32>
    %170 = math.tanh %169 : vector<8x96xf32>
    %cst_76 = arith.constant 5.000000e-01 : f32
    %171 = vector.broadcast %cst_76 : f32 to vector<8x96xf32>
    %172 = arith.mulf %171, %170 : vector<8x96xf32>
    %cst_77 = arith.constant 5.000000e-01 : f32
    %173 = vector.broadcast %cst_77 : f32 to vector<8x96xf32>
    %174 = arith.addf %172, %173 : vector<8x96xf32>
    %175 = vector.extract_strided_slice %166 {offsets = [0, 96], sizes = [8, 32], strides = [1, 1]} : vector<8x128xf32> to vector<8x32xf32>
    %176 = math.tanh %175 : vector<8x32xf32>
    %177 = vector.extract_strided_slice %174 {offsets = [0, 0], sizes = [8, 32], strides = [1, 1]} : vector<8x96xf32> to vector<8x32xf32>
    %178 = vector.extract_strided_slice %174 {offsets = [0, 32], sizes = [8, 32], strides = [1, 1]} : vector<8x96xf32> to vector<8x32xf32>
    %179 = vector.extract_strided_slice %174 {offsets = [0, 64], sizes = [8, 32], strides = [1, 1]} : vector<8x96xf32> to vector<8x32xf32>
    %180 = arith.mulf %178, %157 : vector<8x32xf32>
    %181 = arith.mulf %177, %176 : vector<8x32xf32>
    %182 = arith.addf %180, %181 : vector<8x32xf32>
    %183 = math.tanh %182 : vector<8x32xf32>
    %184 = arith.mulf %179, %183 : vector<8x32xf32>
    %185 = arith.truncf %184 : vector<8x32xf32> to vector<8x32xbf16>
    %c48_78 = arith.constant 48 : index
    %c0_79 = arith.constant 0 : index
    %186 = vector.load %arg14[%c48_78, %c0_79] : memref<64x32xbf16, #tpu.memory_space<vmem>>, vector<8x32xbf16>
    tpu.vector_store %arg14[%c48_78, %c0_79], %185 {strides = array<i32>} : memref<64x32xbf16, #tpu.memory_space<vmem>>, vector<8x32xbf16>,
    %c56 = arith.constant 56 : index
    %c0_80 = arith.constant 0 : index
    %187 = vector.load %arg13[%c56, %c0_80] : memref<64x128xf32, #tpu.memory_space<vmem>>, vector<8x128xf32>
    %188 = arith.truncf %184 : vector<8x32xf32> to vector<8x32xbf16>
    %c0_81 = arith.constant 0 : index
    %c0_82 = arith.constant 0 : index
    %189 = vector.load %arg5[%c0_81, %c0_82] : memref<32x128xbf16, #tpu.memory_space<vmem>>, vector<32x128xbf16>
    %cst_83 = arith.constant dense<0.000000e+00> : vector<8x128xf32>
    %190 = tpu.matmul %188, %189, %cst_83 {dimension_numbers = #tpu.dot_dimension_numbers<[1], [0], [0], [1], [0, 0, 1, 1], [], []>} : vector<8x32xbf16>, vector<32x128xbf16>, vector<8x128xf32> -> vector<8x128xf32>
    %191 = arith.addf %187, %190 : vector<8x128xf32>
    %192 = vector.extract_strided_slice %191 {offsets = [0, 0], sizes = [8, 96], strides = [1, 1]} : vector<8x128xf32> to vector<8x96xf32>
    %cst_84 = arith.constant 5.000000e-01 : f32
    %193 = vector.broadcast %cst_84 : f32 to vector<8x96xf32>
    %194 = arith.mulf %193, %192 : vector<8x96xf32>
    %195 = math.tanh %194 : vector<8x96xf32>
    %cst_85 = arith.constant 5.000000e-01 : f32
    %196 = vector.broadcast %cst_85 : f32 to vector<8x96xf32>
    %197 = arith.mulf %196, %195 : vector<8x96xf32>
    %cst_86 = arith.constant 5.000000e-01 : f32
    %198 = vector.broadcast %cst_86 : f32 to vector<8x96xf32>
    %199 = arith.addf %197, %198 : vector<8x96xf32>
    %200 = vector.extract_strided_slice %191 {offsets = [0, 96], sizes = [8, 32], strides = [1, 1]} : vector<8x128xf32> to vector<8x32xf32>
    %201 = math.tanh %200 : vector<8x32xf32>
    %202 = vector.extract_strided_slice %199 {offsets = [0, 0], sizes = [8, 32], strides = [1, 1]} : vector<8x96xf32> to vector<8x32xf32>
    %203 = vector.extract_strided_slice %199 {offsets = [0, 32], sizes = [8, 32], strides = [1, 1]} : vector<8x96xf32> to vector<8x32xf32>
    %204 = vector.extract_strided_slice %199 {offsets = [0, 64], sizes = [8, 32], strides = [1, 1]} : vector<8x96xf32> to vector<8x32xf32>
    %205 = arith.mulf %203, %182 : vector<8x32xf32>
    %206 = arith.mulf %202, %201 : vector<8x32xf32>
    %207 = arith.addf %205, %206 : vector<8x32xf32>
    %208 = math.tanh %207 : vector<8x32xf32>
    %209 = arith.mulf %204, %208 : vector<8x32xf32>
    %210 = arith.truncf %209 : vector<8x32xf32> to vector<8x32xbf16>
    %c56_87 = arith.constant 56 : index
    %c0_88 = arith.constant 0 : index
    %211 = vector.load %arg14[%c56_87, %c0_88] : memref<64x32xbf16, #tpu.memory_space<vmem>>, vector<8x32xbf16>
    tpu.vector_store %arg14[%c56_87, %c0_88], %210 {strides = array<i32>} : memref<64x32xbf16, #tpu.memory_space<vmem>>, vector<8x32xbf16>,
    %c0_89 = arith.constant 0 : index
    %c0_90 = arith.constant 0 : index
    %212 = vector.load %arg14[%c0_89, %c0_90] : memref<64x32xbf16, #tpu.memory_space<vmem>>, vector<64x32xbf16>
    %c0_91 = arith.constant 0 : index
    %c0_92 = arith.constant 0 : index
    %213 = vector.load %arg7[%c0_91, %c0_92] : memref<32x128xbf16, #tpu.memory_space<vmem>>, vector<32x128xbf16>
    %cst_93 = arith.constant dense<0.000000e+00> : vector<64x128xf32>
    %214 = tpu.matmul %212, %213, %cst_93 {dimension_numbers = #tpu.dot_dimension_numbers<[1], [0], [0], [1], [0, 0, 1, 1], [], []>} : vector<64x32xbf16>, vector<32x128xbf16>, vector<64x128xf32> -> vector<64x128xf32>
    %c0_94 = arith.constant 0 : index
    %c0_95 = arith.constant 0 : index
    %215 = vector.load %arg9[%c0_94, %c0_95] : memref<1x128xf32, #tpu.memory_space<vmem>>, vector<1x128xf32>
    %216 = vector.broadcast %215 : vector<1x128xf32> to vector<64x128xf32>
    %217 = arith.addf %214, %216 : vector<64x128xf32>
    %c0_96 = arith.constant 0 : index
    %c0_97 = arith.constant 0 : index
    %218 = vector.load %arg13[%c0_96, %c0_97] : memref<64x128xf32, #tpu.memory_space<vmem>>, vector<64x128xf32>
    tpu.vector_store %arg13[%c0_96, %c0_97], %217 {strides = array<i32>} : memref<64x128xf32, #tpu.memory_space<vmem>>, vector<64x128xf32>,
    %c0_98 = arith.constant 0 : index
    %c1 = arith.constant 1 : index
    %c0_99 = arith.constant 0 : index
    %c0_100 = arith.constant 0 : index
    %219 = vector.load %arg2[%c0_98, %c1, %c0_99, %c0_100] : memref<1x2x8x32xf32, #tpu.memory_space<vmem>>, vector<1x1x8x32xf32>
    %220 = vector.shape_cast %219 : vector<1x1x8x32xf32> to vector<8x32xf32>
    %c0_101 = arith.constant 0 : index
    %c1_102 = arith.constant 1 : index
    %c0_103 = arith.constant 0 : index
    %c0_104 = arith.constant 0 : index
    %221 = vector.load %arg3[%c0_101, %c1_102, %c0_103, %c0_104] : memref<1x2x8x32xf32, #tpu.memory_space<vmem>>, vector<1x1x8x32xf32>
    %222 = vector.shape_cast %221 : vector<1x1x8x32xf32> to vector<8x32xf32>
    %c0_105 = arith.constant 0 : index
    %c0_106 = arith.constant 0 : index
    %223 = vector.load %arg13[%c0_105, %c0_106] : memref<64x128xf32, #tpu.memory_space<vmem>>, vector<8x128xf32>
    %224 = arith.truncf %220 : vector<8x32xf32> to vector<8x32xbf16>
    %c0_107 = arith.constant 0 : index
    %c0_108 = arith.constant 0 : index
    %225 = vector.load %arg8[%c0_107, %c0_108] : memref<32x128xbf16, #tpu.memory_space<vmem>>, vector<32x128xbf16>
    %cst_109 = arith.constant dense<0.000000e+00> : vector<8x128xf32>
    %226 = tpu.matmul %224, %225, %cst_109 {dimension_numbers = #tpu.dot_dimension_numbers<[1], [0], [0], [1], [0, 0, 1, 1], [], []>} : vector<8x32xbf16>, vector<32x128xbf16>, vector<8x128xf32> -> vector<8x128xf32>
    %227 = arith.addf %223, %226 : vector<8x128xf32>
    %228 = vector.extract_strided_slice %227 {offsets = [0, 0], sizes = [8, 96], strides = [1, 1]} : vector<8x128xf32> to vector<8x96xf32>
    %cst_110 = arith.constant 5.000000e-01 : f32
    %229 = vector.broadcast %cst_110 : f32 to vector<8x96xf32>
    %230 = arith.mulf %229, %228 : vector<8x96xf32>
    %231 = math.tanh %230 : vector<8x96xf32>
    %cst_111 = arith.constant 5.000000e-01 : f32
    %232 = vector.broadcast %cst_111 : f32 to vector<8x96xf32>
    %233 = arith.mulf %232, %231 : vector<8x96xf32>
    %cst_112 = arith.constant 5.000000e-01 : f32
    %234 = vector.broadcast %cst_112 : f32 to vector<8x96xf32>
    %235 = arith.addf %233, %234 : vector<8x96xf32>
    %236 = vector.extract_strided_slice %227 {offsets = [0, 96], sizes = [8, 32], strides = [1, 1]} : vector<8x128xf32> to vector<8x32xf32>
    %237 = math.tanh %236 : vector<8x32xf32>
    %238 = vector.extract_strided_slice %235 {offsets = [0, 0], sizes = [8, 32], strides = [1, 1]} : vector<8x96xf32> to vector<8x32xf32>
    %239 = vector.extract_strided_slice %235 {offsets = [0, 32], sizes = [8, 32], strides = [1, 1]} : vector<8x96xf32> to vector<8x32xf32>
    %240 = vector.extract_strided_slice %235 {offsets = [0, 64], sizes = [8, 32], strides = [1, 1]} : vector<8x96xf32> to vector<8x32xf32>
    %241 = arith.mulf %239, %222 : vector<8x32xf32>
    %242 = arith.mulf %238, %237 : vector<8x32xf32>
    %243 = arith.addf %241, %242 : vector<8x32xf32>
    %244 = math.tanh %243 : vector<8x32xf32>
    %245 = arith.mulf %240, %244 : vector<8x32xf32>
    %c8_113 = arith.constant 8 : index
    %c0_114 = arith.constant 0 : index
    %246 = vector.load %arg13[%c8_113, %c0_114] : memref<64x128xf32, #tpu.memory_space<vmem>>, vector<8x128xf32>
    %247 = arith.truncf %245 : vector<8x32xf32> to vector<8x32xbf16>
    %c0_115 = arith.constant 0 : index
    %c0_116 = arith.constant 0 : index
    %248 = vector.load %arg8[%c0_115, %c0_116] : memref<32x128xbf16, #tpu.memory_space<vmem>>, vector<32x128xbf16>
    %cst_117 = arith.constant dense<0.000000e+00> : vector<8x128xf32>
    %249 = tpu.matmul %247, %248, %cst_117 {dimension_numbers = #tpu.dot_dimension_numbers<[1], [0], [0], [1], [0, 0, 1, 1], [], []>} : vector<8x32xbf16>, vector<32x128xbf16>, vector<8x128xf32> -> vector<8x128xf32>
    %250 = arith.addf %246, %249 : vector<8x128xf32>
    %251 = vector.extract_strided_slice %250 {offsets = [0, 0], sizes = [8, 96], strides = [1, 1]} : vector<8x128xf32> to vector<8x96xf32>
    %cst_118 = arith.constant 5.000000e-01 : f32
    %252 = vector.broadcast %cst_118 : f32 to vector<8x96xf32>
    %253 = arith.mulf %252, %251 : vector<8x96xf32>
    %254 = math.tanh %253 : vector<8x96xf32>
    %cst_119 = arith.constant 5.000000e-01 : f32
    %255 = vector.broadcast %cst_119 : f32 to vector<8x96xf32>
    %256 = arith.mulf %255, %254 : vector<8x96xf32>
    %cst_120 = arith.constant 5.000000e-01 : f32
    %257 = vector.broadcast %cst_120 : f32 to vector<8x96xf32>
    %258 = arith.addf %256, %257 : vector<8x96xf32>
    %259 = vector.extract_strided_slice %250 {offsets = [0, 96], sizes = [8, 32], strides = [1, 1]} : vector<8x128xf32> to vector<8x32xf32>
    %260 = math.tanh %259 : vector<8x32xf32>
    %261 = vector.extract_strided_slice %258 {offsets = [0, 0], sizes = [8, 32], strides = [1, 1]} : vector<8x96xf32> to vector<8x32xf32>
    %262 = vector.extract_strided_slice %258 {offsets = [0, 32], sizes = [8, 32], strides = [1, 1]} : vector<8x96xf32> to vector<8x32xf32>
    %263 = vector.extract_strided_slice %258 {offsets = [0, 64], sizes = [8, 32], strides = [1, 1]} : vector<8x96xf32> to vector<8x32xf32>
    %264 = arith.mulf %262, %243 : vector<8x32xf32>
    %265 = arith.mulf %261, %260 : vector<8x32xf32>
    %266 = arith.addf %264, %265 : vector<8x32xf32>
    %267 = math.tanh %266 : vector<8x32xf32>
    %268 = arith.mulf %263, %267 : vector<8x32xf32>
    %c16_121 = arith.constant 16 : index
    %c0_122 = arith.constant 0 : index
    %269 = vector.load %arg13[%c16_121, %c0_122] : memref<64x128xf32, #tpu.memory_space<vmem>>, vector<8x128xf32>
    %270 = arith.truncf %268 : vector<8x32xf32> to vector<8x32xbf16>
    %c0_123 = arith.constant 0 : index
    %c0_124 = arith.constant 0 : index
    %271 = vector.load %arg8[%c0_123, %c0_124] : memref<32x128xbf16, #tpu.memory_space<vmem>>, vector<32x128xbf16>
    %cst_125 = arith.constant dense<0.000000e+00> : vector<8x128xf32>
    %272 = tpu.matmul %270, %271, %cst_125 {dimension_numbers = #tpu.dot_dimension_numbers<[1], [0], [0], [1], [0, 0, 1, 1], [], []>} : vector<8x32xbf16>, vector<32x128xbf16>, vector<8x128xf32> -> vector<8x128xf32>
    %273 = arith.addf %269, %272 : vector<8x128xf32>
    %274 = vector.extract_strided_slice %273 {offsets = [0, 0], sizes = [8, 96], strides = [1, 1]} : vector<8x128xf32> to vector<8x96xf32>
    %cst_126 = arith.constant 5.000000e-01 : f32
    %275 = vector.broadcast %cst_126 : f32 to vector<8x96xf32>
    %276 = arith.mulf %275, %274 : vector<8x96xf32>
    %277 = math.tanh %276 : vector<8x96xf32>
    %cst_127 = arith.constant 5.000000e-01 : f32
    %278 = vector.broadcast %cst_127 : f32 to vector<8x96xf32>
    %279 = arith.mulf %278, %277 : vector<8x96xf32>
    %cst_128 = arith.constant 5.000000e-01 : f32
    %280 = vector.broadcast %cst_128 : f32 to vector<8x96xf32>
    %281 = arith.addf %279, %280 : vector<8x96xf32>
    %282 = vector.extract_strided_slice %273 {offsets = [0, 96], sizes = [8, 32], strides = [1, 1]} : vector<8x128xf32> to vector<8x32xf32>
    %283 = math.tanh %282 : vector<8x32xf32>
    %284 = vector.extract_strided_slice %281 {offsets = [0, 0], sizes = [8, 32], strides = [1, 1]} : vector<8x96xf32> to vector<8x32xf32>
    %285 = vector.extract_strided_slice %281 {offsets = [0, 32], sizes = [8, 32], strides = [1, 1]} : vector<8x96xf32> to vector<8x32xf32>
    %286 = vector.extract_strided_slice %281 {offsets = [0, 64], sizes = [8, 32], strides = [1, 1]} : vector<8x96xf32> to vector<8x32xf32>
    %287 = arith.mulf %285, %266 : vector<8x32xf32>
    %288 = arith.mulf %284, %283 : vector<8x32xf32>
    %289 = arith.addf %287, %288 : vector<8x32xf32>
    %290 = math.tanh %289 : vector<8x32xf32>
    %291 = arith.mulf %286, %290 : vector<8x32xf32>
    %c24_129 = arith.constant 24 : index
    %c0_130 = arith.constant 0 : index
    %292 = vector.load %arg13[%c24_129, %c0_130] : memref<64x128xf32, #tpu.memory_space<vmem>>, vector<8x128xf32>
    %293 = arith.truncf %291 : vector<8x32xf32> to vector<8x32xbf16>
    %c0_131 = arith.constant 0 : index
    %c0_132 = arith.constant 0 : index
    %294 = vector.load %arg8[%c0_131, %c0_132] : memref<32x128xbf16, #tpu.memory_space<vmem>>, vector<32x128xbf16>
    %cst_133 = arith.constant dense<0.000000e+00> : vector<8x128xf32>
    %295 = tpu.matmul %293, %294, %cst_133 {dimension_numbers = #tpu.dot_dimension_numbers<[1], [0], [0], [1], [0, 0, 1, 1], [], []>} : vector<8x32xbf16>, vector<32x128xbf16>, vector<8x128xf32> -> vector<8x128xf32>
    %296 = arith.addf %292, %295 : vector<8x128xf32>
    %297 = vector.extract_strided_slice %296 {offsets = [0, 0], sizes = [8, 96], strides = [1, 1]} : vector<8x128xf32> to vector<8x96xf32>
    %cst_134 = arith.constant 5.000000e-01 : f32
    %298 = vector.broadcast %cst_134 : f32 to vector<8x96xf32>
    %299 = arith.mulf %298, %297 : vector<8x96xf32>
    %300 = math.tanh %299 : vector<8x96xf32>
    %cst_135 = arith.constant 5.000000e-01 : f32
    %301 = vector.broadcast %cst_135 : f32 to vector<8x96xf32>
    %302 = arith.mulf %301, %300 : vector<8x96xf32>
    %cst_136 = arith.constant 5.000000e-01 : f32
    %303 = vector.broadcast %cst_136 : f32 to vector<8x96xf32>
    %304 = arith.addf %302, %303 : vector<8x96xf32>
    %305 = vector.extract_strided_slice %296 {offsets = [0, 96], sizes = [8, 32], strides = [1, 1]} : vector<8x128xf32> to vector<8x32xf32>
    %306 = math.tanh %305 : vector<8x32xf32>
    %307 = vector.extract_strided_slice %304 {offsets = [0, 0], sizes = [8, 32], strides = [1, 1]} : vector<8x96xf32> to vector<8x32xf32>
    %308 = vector.extract_strided_slice %304 {offsets = [0, 32], sizes = [8, 32], strides = [1, 1]} : vector<8x96xf32> to vector<8x32xf32>
    %309 = vector.extract_strided_slice %304 {offsets = [0, 64], sizes = [8, 32], strides = [1, 1]} : vector<8x96xf32> to vector<8x32xf32>
    %310 = arith.mulf %308, %289 : vector<8x32xf32>
    %311 = arith.mulf %307, %306 : vector<8x32xf32>
    %312 = arith.addf %310, %311 : vector<8x32xf32>
    %313 = math.tanh %312 : vector<8x32xf32>
    %314 = arith.mulf %309, %313 : vector<8x32xf32>
    %c32_137 = arith.constant 32 : index
    %c0_138 = arith.constant 0 : index
    %315 = vector.load %arg13[%c32_137, %c0_138] : memref<64x128xf32, #tpu.memory_space<vmem>>, vector<8x128xf32>
    %316 = arith.truncf %314 : vector<8x32xf32> to vector<8x32xbf16>
    %c0_139 = arith.constant 0 : index
    %c0_140 = arith.constant 0 : index
    %317 = vector.load %arg8[%c0_139, %c0_140] : memref<32x128xbf16, #tpu.memory_space<vmem>>, vector<32x128xbf16>
    %cst_141 = arith.constant dense<0.000000e+00> : vector<8x128xf32>
    %318 = tpu.matmul %316, %317, %cst_141 {dimension_numbers = #tpu.dot_dimension_numbers<[1], [0], [0], [1], [0, 0, 1, 1], [], []>} : vector<8x32xbf16>, vector<32x128xbf16>, vector<8x128xf32> -> vector<8x128xf32>
    %319 = arith.addf %315, %318 : vector<8x128xf32>
    %320 = vector.extract_strided_slice %319 {offsets = [0, 0], sizes = [8, 96], strides = [1, 1]} : vector<8x128xf32> to vector<8x96xf32>
    %cst_142 = arith.constant 5.000000e-01 : f32
    %321 = vector.broadcast %cst_142 : f32 to vector<8x96xf32>
    %322 = arith.mulf %321, %320 : vector<8x96xf32>
    %323 = math.tanh %322 : vector<8x96xf32>
    %cst_143 = arith.constant 5.000000e-01 : f32
    %324 = vector.broadcast %cst_143 : f32 to vector<8x96xf32>
    %325 = arith.mulf %324, %323 : vector<8x96xf32>
    %cst_144 = arith.constant 5.000000e-01 : f32
    %326 = vector.broadcast %cst_144 : f32 to vector<8x96xf32>
    %327 = arith.addf %325, %326 : vector<8x96xf32>
    %328 = vector.extract_strided_slice %319 {offsets = [0, 96], sizes = [8, 32], strides = [1, 1]} : vector<8x128xf32> to vector<8x32xf32>
    %329 = math.tanh %328 : vector<8x32xf32>
    %330 = vector.extract_strided_slice %327 {offsets = [0, 0], sizes = [8, 32], strides = [1, 1]} : vector<8x96xf32> to vector<8x32xf32>
    %331 = vector.extract_strided_slice %327 {offsets = [0, 32], sizes = [8, 32], strides = [1, 1]} : vector<8x96xf32> to vector<8x32xf32>
    %332 = vector.extract_strided_slice %327 {offsets = [0, 64], sizes = [8, 32], strides = [1, 1]} : vector<8x96xf32> to vector<8x32xf32>
    %333 = arith.mulf %331, %312 : vector<8x32xf32>
    %334 = arith.mulf %330, %329 : vector<8x32xf32>
    %335 = arith.addf %333, %334 : vector<8x32xf32>
    %336 = math.tanh %335 : vector<8x32xf32>
    %337 = arith.mulf %332, %336 : vector<8x32xf32>
    %c40_145 = arith.constant 40 : index
    %c0_146 = arith.constant 0 : index
    %338 = vector.load %arg13[%c40_145, %c0_146] : memref<64x128xf32, #tpu.memory_space<vmem>>, vector<8x128xf32>
    %339 = arith.truncf %337 : vector<8x32xf32> to vector<8x32xbf16>
    %c0_147 = arith.constant 0 : index
    %c0_148 = arith.constant 0 : index
    %340 = vector.load %arg8[%c0_147, %c0_148] : memref<32x128xbf16, #tpu.memory_space<vmem>>, vector<32x128xbf16>
    %cst_149 = arith.constant dense<0.000000e+00> : vector<8x128xf32>
    %341 = tpu.matmul %339, %340, %cst_149 {dimension_numbers = #tpu.dot_dimension_numbers<[1], [0], [0], [1], [0, 0, 1, 1], [], []>} : vector<8x32xbf16>, vector<32x128xbf16>, vector<8x128xf32> -> vector<8x128xf32>
    %342 = arith.addf %338, %341 : vector<8x128xf32>
    %343 = vector.extract_strided_slice %342 {offsets = [0, 0], sizes = [8, 96], strides = [1, 1]} : vector<8x128xf32> to vector<8x96xf32>
    %cst_150 = arith.constant 5.000000e-01 : f32
    %344 = vector.broadcast %cst_150 : f32 to vector<8x96xf32>
    %345 = arith.mulf %344, %343 : vector<8x96xf32>
    %346 = math.tanh %345 : vector<8x96xf32>
    %cst_151 = arith.constant 5.000000e-01 : f32
    %347 = vector.broadcast %cst_151 : f32 to vector<8x96xf32>
    %348 = arith.mulf %347, %346 : vector<8x96xf32>
    %cst_152 = arith.constant 5.000000e-01 : f32
    %349 = vector.broadcast %cst_152 : f32 to vector<8x96xf32>
    %350 = arith.addf %348, %349 : vector<8x96xf32>
    %351 = vector.extract_strided_slice %342 {offsets = [0, 96], sizes = [8, 32], strides = [1, 1]} : vector<8x128xf32> to vector<8x32xf32>
    %352 = math.tanh %351 : vector<8x32xf32>
    %353 = vector.extract_strided_slice %350 {offsets = [0, 0], sizes = [8, 32], strides = [1, 1]} : vector<8x96xf32> to vector<8x32xf32>
    %354 = vector.extract_strided_slice %350 {offsets = [0, 32], sizes = [8, 32], strides = [1, 1]} : vector<8x96xf32> to vector<8x32xf32>
    %355 = vector.extract_strided_slice %350 {offsets = [0, 64], sizes = [8, 32], strides = [1, 1]} : vector<8x96xf32> to vector<8x32xf32>
    %356 = arith.mulf %354, %335 : vector<8x32xf32>
    %357 = arith.mulf %353, %352 : vector<8x32xf32>
    %358 = arith.addf %356, %357 : vector<8x32xf32>
    %359 = math.tanh %358 : vector<8x32xf32>
    %360 = arith.mulf %355, %359 : vector<8x32xf32>
    %c48_153 = arith.constant 48 : index
    %c0_154 = arith.constant 0 : index
    %361 = vector.load %arg13[%c48_153, %c0_154] : memref<64x128xf32, #tpu.memory_space<vmem>>, vector<8x128xf32>
    %362 = arith.truncf %360 : vector<8x32xf32> to vector<8x32xbf16>
    %c0_155 = arith.constant 0 : index
    %c0_156 = arith.constant 0 : index
    %363 = vector.load %arg8[%c0_155, %c0_156] : memref<32x128xbf16, #tpu.memory_space<vmem>>, vector<32x128xbf16>
    %cst_157 = arith.constant dense<0.000000e+00> : vector<8x128xf32>
    %364 = tpu.matmul %362, %363, %cst_157 {dimension_numbers = #tpu.dot_dimension_numbers<[1], [0], [0], [1], [0, 0, 1, 1], [], []>} : vector<8x32xbf16>, vector<32x128xbf16>, vector<8x128xf32> -> vector<8x128xf32>
    %365 = arith.addf %361, %364 : vector<8x128xf32>
    %366 = vector.extract_strided_slice %365 {offsets = [0, 0], sizes = [8, 96], strides = [1, 1]} : vector<8x128xf32> to vector<8x96xf32>
    %cst_158 = arith.constant 5.000000e-01 : f32
    %367 = vector.broadcast %cst_158 : f32 to vector<8x96xf32>
    %368 = arith.mulf %367, %366 : vector<8x96xf32>
    %369 = math.tanh %368 : vector<8x96xf32>
    %cst_159 = arith.constant 5.000000e-01 : f32
    %370 = vector.broadcast %cst_159 : f32 to vector<8x96xf32>
    %371 = arith.mulf %370, %369 : vector<8x96xf32>
    %cst_160 = arith.constant 5.000000e-01 : f32
    %372 = vector.broadcast %cst_160 : f32 to vector<8x96xf32>
    %373 = arith.addf %371, %372 : vector<8x96xf32>
    %374 = vector.extract_strided_slice %365 {offsets = [0, 96], sizes = [8, 32], strides = [1, 1]} : vector<8x128xf32> to vector<8x32xf32>
    %375 = math.tanh %374 : vector<8x32xf32>
    %376 = vector.extract_strided_slice %373 {offsets = [0, 0], sizes = [8, 32], strides = [1, 1]} : vector<8x96xf32> to vector<8x32xf32>
    %377 = vector.extract_strided_slice %373 {offsets = [0, 32], sizes = [8, 32], strides = [1, 1]} : vector<8x96xf32> to vector<8x32xf32>
    %378 = vector.extract_strided_slice %373 {offsets = [0, 64], sizes = [8, 32], strides = [1, 1]} : vector<8x96xf32> to vector<8x32xf32>
    %379 = arith.mulf %377, %358 : vector<8x32xf32>
    %380 = arith.mulf %376, %375 : vector<8x32xf32>
    %381 = arith.addf %379, %380 : vector<8x32xf32>
    %382 = math.tanh %381 : vector<8x32xf32>
    %383 = arith.mulf %378, %382 : vector<8x32xf32>
    %c56_161 = arith.constant 56 : index
    %c0_162 = arith.constant 0 : index
    %384 = vector.load %arg13[%c56_161, %c0_162] : memref<64x128xf32, #tpu.memory_space<vmem>>, vector<8x128xf32>
    %385 = arith.truncf %383 : vector<8x32xf32> to vector<8x32xbf16>
    %c0_163 = arith.constant 0 : index
    %c0_164 = arith.constant 0 : index
    %386 = vector.load %arg8[%c0_163, %c0_164] : memref<32x128xbf16, #tpu.memory_space<vmem>>, vector<32x128xbf16>
    %cst_165 = arith.constant dense<0.000000e+00> : vector<8x128xf32>
    %387 = tpu.matmul %385, %386, %cst_165 {dimension_numbers = #tpu.dot_dimension_numbers<[1], [0], [0], [1], [0, 0, 1, 1], [], []>} : vector<8x32xbf16>, vector<32x128xbf16>, vector<8x128xf32> -> vector<8x128xf32>
    %388 = arith.addf %384, %387 : vector<8x128xf32>
    %389 = vector.extract_strided_slice %388 {offsets = [0, 0], sizes = [8, 96], strides = [1, 1]} : vector<8x128xf32> to vector<8x96xf32>
    %cst_166 = arith.constant 5.000000e-01 : f32
    %390 = vector.broadcast %cst_166 : f32 to vector<8x96xf32>
    %391 = arith.mulf %390, %389 : vector<8x96xf32>
    %392 = math.tanh %391 : vector<8x96xf32>
    %cst_167 = arith.constant 5.000000e-01 : f32
    %393 = vector.broadcast %cst_167 : f32 to vector<8x96xf32>
    %394 = arith.mulf %393, %392 : vector<8x96xf32>
    %cst_168 = arith.constant 5.000000e-01 : f32
    %395 = vector.broadcast %cst_168 : f32 to vector<8x96xf32>
    %396 = arith.addf %394, %395 : vector<8x96xf32>
    %397 = vector.extract_strided_slice %388 {offsets = [0, 96], sizes = [8, 32], strides = [1, 1]} : vector<8x128xf32> to vector<8x32xf32>
    %398 = math.tanh %397 : vector<8x32xf32>
    %399 = vector.extract_strided_slice %396 {offsets = [0, 0], sizes = [8, 32], strides = [1, 1]} : vector<8x96xf32> to vector<8x32xf32>
    %400 = vector.extract_strided_slice %396 {offsets = [0, 32], sizes = [8, 32], strides = [1, 1]} : vector<8x96xf32> to vector<8x32xf32>
    %401 = vector.extract_strided_slice %396 {offsets = [0, 64], sizes = [8, 32], strides = [1, 1]} : vector<8x96xf32> to vector<8x32xf32>
    %402 = arith.mulf %400, %381 : vector<8x32xf32>
    %403 = arith.mulf %399, %398 : vector<8x32xf32>
    %404 = arith.addf %402, %403 : vector<8x32xf32>
    %405 = math.tanh %404 : vector<8x32xf32>
    %406 = arith.mulf %401, %405 : vector<8x32xf32>
    %c0_169 = arith.constant 0 : index
    %c0_170 = arith.constant 0 : index
    %407 = vector.load %arg10[%c0_169, %c0_170] : memref<1x32xf32, #tpu.memory_space<vmem>>, vector<1x32xf32>
    %408 = vector.broadcast %407 : vector<1x32xf32> to vector<8x32xf32>
    %409 = arith.mulf %406, %408 : vector<8x32xf32>
    %cst_171 = arith.constant dense<0.000000e+00> : vector<8xf32>
    %410 = vector.multi_reduction <add>, %409, %cst_171 [1] : vector<8x32xf32> to vector<8xf32>
    %411 = vector.shape_cast %410 : vector<8xf32> to vector<8x1xf32>
    %c0_172 = arith.constant 0 : index
    %c0_173 = arith.constant 0 : index
    %412 = vector.load %arg11[%c0_172, %c0_173] : memref<1x1xf32, #tpu.memory_space<vmem>>, vector<1x1xf32>
    %413 = vector.broadcast %412 : vector<1x1xf32> to vector<8x1xf32>
    %414 = arith.addf %411, %413 : vector<8x1xf32>
    %c0_174 = arith.constant 0 : index
    %c0_175 = arith.constant 0 : index
    %c0_176 = arith.constant 0 : index
    %415 = vector.load %arg12[%c0_174, %c0_175, %c0_176] : memref<1x8x1xf32, #tpu.memory_space<vmem>>, vector<1x8x1xf32>
    %416 = vector.shape_cast %415 : vector<1x8x1xf32> to vector<8x1xf32>
    %417 = vector.shape_cast %414 : vector<8x1xf32> to vector<1x8x1xf32>
    tpu.vector_store %arg12[%c0_174, %c0_175, %c0_176], %417 {strides = array<i32>} : memref<1x8x1xf32, #tpu.memory_space<vmem>>, vector<1x8x1xf32>,
    return
  }
  func.func @transform_0(%arg0: i32) -> (i32, i32, i32) {
    %c0_i32 = arith.constant 0 : i32
    %c0_i32_0 = arith.constant 0 : i32
    %c0_i32_1 = arith.constant 0 : i32
    return %arg0, %c0_i32, %c0_i32_0 : i32, i32, i32
  }
  func.func @transform_1(%arg0: i32) -> (i32, i32, i32, i32) {
    %c0_i32 = arith.constant 0 : i32
    %c0_i32_0 = arith.constant 0 : i32
    %c0_i32_1 = arith.constant 0 : i32
    %c0_i32_2 = arith.constant 0 : i32
    return %arg0, %c0_i32, %c0_i32_0, %c0_i32_1 : i32, i32, i32, i32
  }
  func.func @transform_2(%arg0: i32) -> (i32, i32, i32, i32) {
    %c0_i32 = arith.constant 0 : i32
    %c0_i32_0 = arith.constant 0 : i32
    %c0_i32_1 = arith.constant 0 : i32
    %c0_i32_2 = arith.constant 0 : i32
    return %arg0, %c0_i32, %c0_i32_0, %c0_i32_1 : i32, i32, i32, i32
  }
  func.func @transform_3(%arg0: i32) -> (i32, i32) {
    %c0_i32 = arith.constant 0 : i32
    %c0_i32_0 = arith.constant 0 : i32
    %c0_i32_1 = arith.constant 0 : i32
    return %c0_i32, %c0_i32_0 : i32, i32
  }
  func.func @transform_4(%arg0: i32) -> (i32, i32) {
    %c0_i32 = arith.constant 0 : i32
    %c0_i32_0 = arith.constant 0 : i32
    %c0_i32_1 = arith.constant 0 : i32
    return %c0_i32, %c0_i32_0 : i32, i32
  }
  func.func @transform_5(%arg0: i32) -> (i32, i32) {
    %c0_i32 = arith.constant 0 : i32
    %c0_i32_0 = arith.constant 0 : i32
    %c0_i32_1 = arith.constant 0 : i32
    return %c0_i32, %c0_i32_0 : i32, i32
  }
  func.func @transform_6(%arg0: i32) -> (i32, i32) {
    %c0_i32 = arith.constant 0 : i32
    %c0_i32_0 = arith.constant 0 : i32
    %c0_i32_1 = arith.constant 0 : i32
    return %c0_i32, %c0_i32_0 : i32, i32
  }
  func.func @transform_7(%arg0: i32) -> (i32, i32) {
    %c0_i32 = arith.constant 0 : i32
    %c0_i32_0 = arith.constant 0 : i32
    %c0_i32_1 = arith.constant 0 : i32
    return %c0_i32, %c0_i32_0 : i32, i32
  }
  func.func @transform_8(%arg0: i32) -> (i32, i32) {
    %c0_i32 = arith.constant 0 : i32
    %c0_i32_0 = arith.constant 0 : i32
    %c0_i32_1 = arith.constant 0 : i32
    return %c0_i32, %c0_i32_0 : i32, i32
  }
  func.func @transform_9(%arg0: i32) -> (i32, i32) {
    %c0_i32 = arith.constant 0 : i32
    %c0_i32_0 = arith.constant 0 : i32
    %c0_i32_1 = arith.constant 0 : i32
    return %c0_i32, %c0_i32_0 : i32, i32
  }
  func.func @transform_10(%arg0: i32) -> (i32, i32) {
    %c0_i32 = arith.constant 0 : i32
    %c0_i32_0 = arith.constant 0 : i32
    %c0_i32_1 = arith.constant 0 : i32
    return %c0_i32, %c0_i32_0 : i32, i32
  }
  func.func @transform_11(%arg0: i32) -> (i32, i32, i32) {
    %c0_i32 = arith.constant 0 : i32
    %c0_i32_0 = arith.constant 0 : i32
    %c0_i32_1 = arith.constant 0 : i32
    return %arg0, %c0_i32, %c0_i32_0 : i32, i32, i32
  }
}

</mosaic_0001>

<bundles_post_ra>
// kernel: tpu_custom_call.1
= control target key start
LH: loop header
LB: loop body
LE: loop exit
PB: predicated region body
PF: predicated region fallthrough
CT: control target
= control target key end

     0   :  { %s2639_s0 = inlined_call_operand.vmem [shape: bf16[1,64,8], index: 0, kind: input, shape index: {}]   ;;  %s2640_s1 = inlined_call_operand.vmem [shape: f32[1,2,8,32], index: 1, kind: input, shape index: {}]   ;;  %s2641_s2 = inlined_call_operand.vmem [shape: f32[1,2,8,32], index: 2, kind: input, shape index: {}]   ;;  %s2642_s3 = inlined_call_operand.hbm [shape: bf16[8,128], index: 3, kind: input, shape index: {}]   ;;  %s2643_s4 = inlined_call_operand.hbm [shape: bf16[32,128], index: 4, kind: input, shape index: {}]   ;;  %s2644_s5 = inlined_call_operand.hbm [shape: f32[1,128], index: 5, kind: input, shape index: {}]   ;;  %s2645_s6 = inlined_call_operand.vmem [shape: bf16[32,128], index: 6, kind: input, shape index: {}]   ;;  %s2646_s7 = inlined_call_operand.hbm [shape: bf16[32,128], index: 7, kind: input, shape index: {}]   ;;  %s2647_s8 = inlined_call_operand.vmem [shape: f32[1,128], index: 8, kind: input, shape index: {}]   ;;  %s2648_s9 = inlined_call_operand.vmem [shape: f32[1,32], index: 9, kind: input, shape index: {}]   ;;  %s2649_s10 = inlined_call_operand.<no memory space> [shape: f32[1,1], index: 10, kind: input, shape index: {}]   ;;  %s2650_s11 = inlined_call_operand.vmem [shape: f32[1,8,1], index: 11, kind: output, shape index: {}]  }
   0x1   :  { %v16_v0 = vstv %s2649_s10 }
   0x2   :  { %17 = vst [vmem:[#allocation4] sm:$0x1] %v16_v0 }
   0x3   :  { %18 = vsyncpa [#allocation6], 0 }
   0x4   :  { %19 = vsyncpa [#allocation8], 0 }
   0x5   :  { %20 = vsyncpa [#allocation11], 0  ;;  %s2231_s19 = smov [#allocation7]  }
   0x6   :  { %s42_s20 = sshll.u32 %s2231_s19, 4  ;;  %s43_s20 = int_to_ptr.vmem [resolvable:$true] %s42_s20 }
   0x7   :  { %s2153_s21 = scalar_lea.vmem %s43_s20, 256  ;;  %p2158_p1 = scmp.lt.s32.totalorder %s43_s20, %s43_s20 }
   0x8   :  { %p2154_p0 = scmp.ne.s32.totalorder %s43_s20, %s2153_s21  ;;  %p2159_p2 = scmp.lt.s32.totalorder %s2153_s21, %s2153_s21 }
   0xa   :  { %p2160_p3 = por %p2159_p2, %p2158_p1 }
   0xc   :  { %p2161_p4 = pnand %p2160_p3, %p2154_p0 }
   0xe   :  { %2164 = shalt.err (!%p2161_p4)
}
   0xf   :  { %s2232_s22 = smov 64   ;;  %s2233_s23 = smov 4  }
  0x10   :  { %48 = dma.hbm_to_vmem [thread:$0]  %s2643_s4, 256, %s43_s20, [#allocation8], %s2232_s22, %s2232_s22, %s2233_s23  }
  0x11   :  { %s2234_s25 = smov [#allocation5]   ;;  %s2235_s27 = smov [#allocation9]  }
  0x12   :  { %s33_s26 = sshll.u32 %s2234_s25, 4  ;;  %s55_s28 = sshll.u32 %s2235_s27, 4  ;;  %s34_s26 = int_to_ptr.vmem [resolvable:$true] %s33_s26  ;;  %s56_s28 = int_to_ptr.vmem [resolvable:$true] %s55_s28 }
  0x13   :  { %s2173_s29 = scalar_lea.vmem %s34_s26, 64  ;;  %p2178_p6 = scmp.lt.s32.totalorder %s34_s26, %s34_s26 }
  0x14   :  { %p2174_p5 = scmp.ne.s32.totalorder %s34_s26, %s2173_s29  ;;  %p2179_p7 = scmp.lt.s32.totalorder %s2173_s29, %s2173_s29 }
  0x16   :  { %p2180_p8 = por %p2179_p7, %p2178_p6 }
  0x18   :  { %p2181_p9 = pnand %p2180_p8, %p2174_p5 }
  0x1a   :  { %2184 = shalt.err (!%p2181_p9)
}
  0x1b   :  { %36 = dma.hbm_to_vmem [thread:$0]  %s2642_s3, 64, %s34_s26, [#allocation6]  }
  0x1c   :  { %s2193_s13 = scalar_lea.vmem %s56_s28, 16  ;;  %s2197_s4 = scalar_lea.vmem %s56_s28, 32 }
  0x1d   :  { %p2194_p10 = scmp.ne.s32.totalorder %s56_s28, %s2193_s13  ;;  %p2198_p11 = scmp.lt.s32.totalorder %s56_s28, %s56_s28 }
  0x1e   :  { %p2199_p12 = scmp.lt.s32.totalorder %s2197_s4, %s2193_s13 }
  0x20   :  { %p2200_p13 = por %p2199_p12, %p2198_p11 }
  0x22   :  { %p2201_p0 = pnand %p2200_p13, %p2194_p10 }
  0x24   :  { %2204 = shalt.err (!%p2201_p0)
}
  0x25   :  { %58 = dma.hbm_to_vmem [thread:$0]  %s2644_s5, 16, %s56_s28, [#allocation8]  }
  0x26   :  { %s2236_s16 = smov [#allocation10]  }
  0x27   :  { %s66_s17 = sshll.u32 %s2236_s16, 4  ;;  %s67_s17 = int_to_ptr.vmem [resolvable:$true] %s66_s17 }
  0x28   :  { %s2213_s18 = scalar_lea.vmem %s67_s17, 256  ;;  %p2218_p2 = scmp.lt.s32.totalorder %s67_s17, %s67_s17 }
  0x29   :  { %p2214_p1 = scmp.ne.s32.totalorder %s67_s17, %s2213_s18  ;;  %p2219_p3 = scmp.lt.s32.totalorder %s2213_s18, %s2213_s18 }
  0x2b   :  { %p2220_p4 = por %p2219_p3, %p2218_p2 }
  0x2d   :  { %p2221_p5 = pnand %p2220_p4, %p2214_p1 }
  0x2f   :  { %2224 = shalt.err (!%p2221_p5)
}
  0x30   :  { %72 = dma.hbm_to_vmem [thread:$0]  %s2646_s7, 256, %s67_s17, [#allocation11], %s2232_s22, %s2232_s22, %s2233_s23  }
  0x31   :  { %2225 = dma.done.wait [#allocation6], 64  }
  0x32   :  { %2226 = vsyncadd [#allocation6], 4294967232 }
  0x33   :  { %2227 = dma.done.wait [#allocation8], 272  }
  0x34   :  { %2228 = vsyncadd [#allocation8], 4294967024 }
  0x35   :  { %2229 = dma.done.wait [#allocation11], 256  }
  0x36   :  { %2230 = vsyncadd [#allocation11], 4294967040  ;;  %v2237_v1 = vmov 0.0   ;;  %vm2238_vm0 = vmmov 0   ;;  %vm141_vm1 = vcmask 1043456   ;;  %vm128_vm2 = vcmask 64512  }
  0x37   :  { %1871 = vmatprep.subr.bf16.mxu1 %v2237_v1  ;;  %1875 = vmatprep.mubr.msk.bf16.mxu1 %vm2238_vm0, %v2237_v1  ;;  %v100_v2 = vld [vmem:[#allocation5] sm:$0xf]  ;;  %v2021_v4 = vld [vmem:[#allocation7 + $0x8] sm:$0xff]   ;;  %v2024_v7 = vld [vmem:[#allocation7] sm:$0xff]   ;;  %vm238_vm3 = vcmask 261120   ;;  %s2239_s24 = smov 32  }
  0x38   :  { %2011 = vmatprep.subr.msk.bf16.mxu0 %vm141_vm1, %v100_v2  ;;  %v143_v3 = vsel %vm141_vm1, %v100_v2, 0  ;;  %v2022_v5 = vld [vmem:[%s2639_s0] sm:$0xff]   ;;  %1872 = vmatpush3.bf16.msra.mxu1 %v2021_v4  ;;  %v2023_v6 = vld [vmem:[%s2639_s0 + $0x8] sm:$0xff]   ;;  %v2343_v11 = vld [vmem:[#allocation9] ss:$0 sm:$0xff]  ;;  %vm316_vm4 = vcmask 257024  }
  0x39   :  { %1862 = vmatpush3.bf16.msra.mxu0 %v143_v3  ;;  %1863 = vmatprep.mubr.msk.bf16.mxu0 %vm128_vm2, %v2022_v5  ;;  %v218_v8 = vld [vmem:[%s2640_s1] sm:$0xff]  ;;  %v2025_v31 = vld [vmem:[#allocation7 + $0x8] sm:$0xff]   ;;  %v2029_v58 = vld [vmem:[%s2639_s0 + $0x18] sm:$0xff]   ;;  %vm1719_vm5 = vcmask 7168  }
  0x3a   :  { %1887 = vmatprep.subr.bf16.mxu0 %v2237_v1  ;;  %1873 = vmatprep.subr.bf16.mxu1 %v2237_v1  ;;  %v221_v9 = vpack.c.bf16 %v218_v8, %v218_v8  ;;  %v219_v20 = vld [vmem:[%s2641_s2] sm:$0xff]  ;;  %v2027_v56 = vld [vmem:[#allocation7 + $0x8] sm:$0xff]  }
  0x3b   :  { %v2026_v32 = vld [vmem:[#allocation7] sm:$0xff]   ;;  %v2028_v57 = vld [vmem:[%s2639_s0 + $0x10] sm:$0xff]  }
  0x3c   :  { %1864 = vmatmul.mubr.msk.bf16.vlgmr.msra.gmra.mxu0 %vm128_vm2, %v2023_v6  ;;  %1874 = vmatpush3.bf16.msra.mxu1 %v2024_v7  ;;  %v2030_v59 = vld [vmem:[#allocation7] sm:$0xff]  }
  0x3d   :  { %1879 = vmatprep.subr.bf16.mxu1 %v2237_v1  ;;  %1888 = vmatpush3.bf16.msra.mxu0 %v2027_v56 }
  0x3e   :  { %1867 = vmatprep.mubr.msk.bf16.mxu0 %vm128_vm2, %v2028_v57  ;;  %1889 = vmatprep.subr.bf16.mxu0 %v2237_v1 }
  0x3f   :  { %1876 = vmatmul.mubr.msk.bf16.vlgmr.msra.gmra.mxu1 %vm238_vm3, %v221_v9 }
  0x40   :  { %1883 = vmatprep.mubr.msk.bf16.mxu1 %vm2238_vm0, %v2237_v1  ;;  %1880 = vmatpush3.bf16.msra.mxu1 %v2025_v31 }
  0x41   :  { %1881 = vmatprep.subr.bf16.mxu1 %v2237_v1  ;;  %1890 = vmatpush3.bf16.msra.mxu0 %v2030_v59 }
  0x42   :  { %1903 = vmatprep.subr.bf16.mxu0 %v2237_v1 }
  0x44   :  { %1882 = vmatpush3.bf16.msra.mxu1 %v2026_v32  ;;  %1868 = vmatmul.mubr.msk.bf16.gmra.mxu0 %vm128_vm2, %v2029_v58 }
  0x45   :  { %1895 = vmatprep.subr.bf16.mxu1 %v2237_v1  ;;  %1891 = vmatprep.mubr.msk.bf16.mxu0 %vm2238_vm0, %v2237_v1 }
  0xfc   :  { %v2341_v10 = vpop.f32.mrf.mxu0 }
  0xfd   :  { %v188_v6 = vadd.f32 %v2341_v10, %v2343_v11 }
  0xfe   :  { %v179_v12 = vpop.f32.mrf.mxu0 }
  0xff   :  { %v180_v13 = vadd.f32 %v2343_v11, %v179_v12  ;;  %v276_v14 = vpop.f32.mrf.mxu1 }
 0x100   :  { %v2362_v38 = vpop.f32.mrf.mxu0 }
 0x101   :  { %v282_v15 = vadd.f32 %v276_v14, %v180_v13  ;;  %v1877_v16 = vpop.f32.mrf.mxu1 }
 0x102   :  { %v182_v39 = vpop.f32.mrf.mxu0 }
 0x103   :  { %2049 = vtanh.f32 %v282_v15  ;;  %v279_v17 = vpop.f32.mrf.mxu1  ;;  %v283_v21 = vmul.f32 0.5, %v282_v15  ;;  %v183_v40 = vadd.f32 %v2343_v11, %v182_v39 }
 0x104   :  { %v2387_v2 = vpop.f32.mrf.mxu0 }
 0x105   :  { %v1878_v18 = vpop.f32.mrf.mxu1  ;;  %2051 = vtanh.f32 %v283_v21 }
 0x106   :  { %v2389_v3 = vpop.f32.mrf.mxu0 }
 0x108   :  { %v2391_v4 = vpop.f32.mrf.mxu0 }
 0x10a   :  { %v2393_v5 = vpop.f32.mrf.mxu0 }
 0x110   :  { %v2050_v19 = vpop.eup %2049 }
 0x111   :  { %294 = vrot.lane.b32.xlu0 %v2050_v19, %s2239_s24 }
 0x112   :  { %v2052_v22 = vpop.eup %2051 }
 0x113   :  { %v285_v23 = vmul.f32 0.5, %v2052_v22 }
 0x115   :  { %289 = vrot.lane.b32.xlu0 %v219_v20, %s2239_s24  ;;  %v286_v24 = vadd.f32 0.5, %v285_v23  ;;  %v2031_v23 = vld [vmem:[#allocation7 + $0x8] sm:$0xff]  }
 0x183   :  { %v295_v25 = vpop.permute.xlu0 %294 }
 0x184   :  { %v297_v26 = vmul.f32 %v295_v25, %v286_v24 }
 0x186   :  { %299 = vrot.lane.b32.xlu1 %v297_v26, %s2239_s24 }
 0x187   :  { %v290_v27 = vpop.permute.xlu0 %289 }
 0x188   :  { %v292_v28 = vmul.f32 %v290_v27, %v286_v24 }
 0x1f8   :  { %v300_v29 = vpop.permute.xlu1 %299 }
 0x1f9   :  { %v302_v30 = vadd.f32 %v300_v29, %v292_v28 }
 0x1fb   :  { %2053 = vtanh.f32 %v302_v30 }
 0x208   :  { %v2054_v33 = vpop.eup %2053 }
 0x209   :  { %305 = vrot.lane.b32.xlu1 %v2054_v33, %s2239_s24 }
 0x27b   :  { %v306_v34 = vpop.permute.xlu1 %305 }
 0x27c   :  { %v308_v35 = vmul.f32 %v306_v34, %v286_v24  ;;  %v2032_v24 = vld [vmem:[#allocation7] sm:$0xff]  }
 0x27e   :  { %v2355_v36 = vpack.c.bf16 %v308_v35, %v308_v35 }
 0x280   :  { %323 = vrot.lane.b32.xlu0 %v2355_v36, %s2232_s22 }
 0x2f2   :  { %v324_v37 = vpop.permute.xlu0 %323 }
 0x2f3   :  { %1884 = vmatmul.mubr.msk.bf16.vlgmr.msra.gmra.mxu1 %vm238_vm3, %v324_v37 }
 0x2f4   :  { %1899 = vmatprep.mubr.msk.bf16.mxu1 %vm2238_vm0, %v2237_v1  ;;  %1896 = vmatpush3.bf16.msra.mxu1 %v2031_v23 }
 0x2f5   :  { %1897 = vmatprep.subr.bf16.mxu1 %v2237_v1 }
 0x2f8   :  { %1898 = vmatpush3.bf16.msra.mxu1 %v2032_v24 }
 0x2f9   :  { %1911 = vmatprep.subr.bf16.mxu1 %v2237_v1 }
 0x3b3   :  { %v374_v41 = vpop.f32.mrf.mxu1 }
 0x3b4   :  { %v380_v42 = vadd.f32 %v374_v41, %v183_v40 }
 0x3b5   :  { %v1885_v43 = vpop.f32.mrf.mxu1 }
 0x3b6   :  { %2055 = vtanh.f32 %v380_v42  ;;  %v381_v47 = vmul.f32 0.5, %v380_v42 }
 0x3b7   :  { %v377_v44 = vpop.f32.mrf.mxu1 }
 0x3b8   :  { %2057 = vtanh.f32 %v381_v47  ;;  %v2033_v47 = vld [vmem:[#allocation7 + $0x8] sm:$0xff]  }
 0x3b9   :  { %v1886_v45 = vpop.f32.mrf.mxu1 }
 0x3c3   :  { %v2056_v46 = vpop.eup %2055 }
 0x3c4   :  { %388 = vrot.lane.b32.xlu1 %v2056_v46, %s2239_s24 }
 0x3c5   :  { %v2058_v48 = vpop.eup %2057 }
 0x3c6   :  { %v383_v49 = vmul.f32 0.5, %v2058_v48  ;;  %v2034_v48 = vld [vmem:[#allocation7] sm:$0xff]  }
 0x3c8   :  { %v384_v50 = vadd.f32 0.5, %v383_v49 }
 0x3ca   :  { %v386_v53 = vmul.f32 %v384_v50, %v302_v30  ;;  %v191_v30 = vadd.f32 %v2362_v38, %v2343_v11 }
 0x436   :  { %v389_v51 = vpop.permute.xlu1 %388 }
 0x437   :  { %v391_v52 = vmul.f32 %v389_v51, %v384_v50 }
 0x439   :  { %393 = vrot.lane.b32.xlu0 %v391_v52, %s2239_s24 }
 0x4ab   :  { %v394_v54 = vpop.permute.xlu0 %393 }
 0x4ac   :  { %v396_v55 = vadd.f32 %v394_v54, %v386_v53  ;;  %v196_v54 = vadd.f32 %v2343_v11, %v2389_v3 }
 0x4ae   :  { %2059 = vtanh.f32 %v396_v55 }
 0x4bb   :  { %v2060_v60 = vpop.eup %2059 }
 0x4bc   :  { %399 = vrot.lane.b32.xlu1 %v2060_v60, %s2239_s24 }
 0x52e   :  { %v400_v61 = vpop.permute.xlu1 %399 }
 0x52f   :  { %v402_v62 = vmul.f32 %v400_v61, %v384_v50 }
 0x531   :  { %v2380_v63 = vpack.c.bf16 %v402_v62, %v402_v62 }
 0x533   :  { %416 = vrot.lane.b32.xlu0 %v2380_v63, %s2232_s22 }
 0x5a5   :  { %v417_v0 = vpop.permute.xlu0 %416 }
 0x5a6   :  { %1892 = vmatmul.mubr.msk.bf16.vlgmr.msra.gmra.mxu0 %vm238_vm3, %v417_v0 }
 0x5a7   :  { %1907 = vmatprep.mubr.msk.bf16.mxu0 %vm2238_vm0, %v2237_v1  ;;  %1904 = vmatpush3.bf16.msra.mxu0 %v2033_v47 }
 0x5a8   :  { %1905 = vmatprep.subr.bf16.mxu0 %v2237_v1 }
 0x5ab   :  { %1906 = vmatpush3.bf16.msra.mxu0 %v2034_v48 }
 0x5ac   :  { %1919 = vmatprep.subr.bf16.mxu0 %v2237_v1 }
 0x666   :  { %v467_v7 = vpop.f32.mrf.mxu0 }
 0x667   :  { %v473_v8 = vadd.f32 %v467_v7, %v188_v6 }
 0x668   :  { %v1893_v9 = vpop.f32.mrf.mxu0 }
 0x669   :  { %2061 = vtanh.f32 %v473_v8  ;;  %v474_v15 = vmul.f32 0.5, %v473_v8 }
 0x66a   :  { %v470_v12 = vpop.f32.mrf.mxu0 }
 0x66b   :  { %2063 = vtanh.f32 %v474_v15 }
 0x66c   :  { %v1894_v13 = vpop.f32.mrf.mxu0 }
 0x66d   :  { %v2035_v13 = vld [vmem:[#allocation7 + $0x8] sm:$0xff]  }
 0x676   :  { %v2062_v14 = vpop.eup %2061 }
 0x677   :  { %481 = vrot.lane.b32.xlu1 %v2062_v14, %s2239_s24  ;;  %v2036_v14 = vld [vmem:[#allocation7] sm:$0xff]  }
 0x678   :  { %v2064_v16 = vpop.eup %2063 }
 0x679   :  { %v476_v17 = vmul.f32 0.5, %v2064_v16 }
 0x67b   :  { %v477_v18 = vadd.f32 0.5, %v476_v17 }
 0x67d   :  { %v479_v21 = vmul.f32 %v477_v18, %v396_v55 }
 0x6e9   :  { %v482_v19 = vpop.permute.xlu1 %481 }
 0x6ea   :  { %v484_v20 = vmul.f32 %v482_v19, %v477_v18 }
 0x6ec   :  { %486 = vrot.lane.b32.xlu0 %v484_v20, %s2239_s24  ;;  %v199_v20 = vadd.f32 %v2343_v11, %v2393_v5 }
 0x75e   :  { %v487_v10 = vpop.permute.xlu0 %486 }
 0x75f   :  { %v489_v22 = vadd.f32 %v487_v10, %v479_v21 }
 0x761   :  { %2065 = vtanh.f32 %v489_v22 }
 0x76e   :  { %v2066_v25 = vpop.eup %2065 }
 0x76f   :  { %492 = vrot.lane.b32.xlu1 %v2066_v25, %s2239_s24 }
 0x7e1   :  { %v493_v26 = vpop.permute.xlu1 %492 }
 0x7e2   :  { %v495_v27 = vmul.f32 %v493_v26, %v477_v18 }
 0x7e4   :  { %v2402_v28 = vpack.c.bf16 %v495_v27, %v495_v27 }
 0x7e6   :  { %509 = vrot.lane.b32.xlu0 %v2402_v28, %s2232_s22 }
 0x858   :  { %v510_v29 = vpop.permute.xlu0 %509 }
 0x859   :  { %1900 = vmatmul.mubr.msk.bf16.vlgmr.msra.gmra.mxu1 %vm238_vm3, %v510_v29 }
 0x85a   :  { %1915 = vmatprep.mubr.msk.bf16.mxu1 %vm2238_vm0, %v2237_v1  ;;  %1912 = vmatpush3.bf16.msra.mxu1 %v2035_v13  ;;  %v2487_v13 = vld [vmem:[#allocation10] sm:$0xff]  }
 0x85b   :  { %1913 = vmatprep.subr.bf16.mxu1 %v2237_v1 }
 0x85e   :  { %1914 = vmatpush3.bf16.msra.mxu1 %v2036_v14  ;;  %v1781_v14 = vld [vmem:[%s2641_s2 + $0x8] sm:$0xff] }
 0x85f   :  { %1927 = vmatprep.subr.bf16.mxu1 %v2237_v1 }
 0x919   :  { %v560_v31 = vpop.f32.mrf.mxu1 }
 0x91a   :  { %v566_v32 = vadd.f32 %v560_v31, %v191_v30 }
 0x91b   :  { %v1901_v33 = vpop.f32.mrf.mxu1 }
 0x91c   :  { %2067 = vtanh.f32 %v566_v32  ;;  %v567_v39 = vmul.f32 0.5, %v566_v32 }
 0x91d   :  { %v563_v34 = vpop.f32.mrf.mxu1 }
 0x91e   :  { %2069 = vtanh.f32 %v567_v39 }
 0x91f   :  { %v1902_v35 = vpop.f32.mrf.mxu1 }
 0x920   :  { %v2037_v35 = vld [vmem:[#allocation7 + $0x8] sm:$0xff]  }
 0x929   :  { %v2068_v37 = vpop.eup %2067 }
 0x92a   :  { %574 = vrot.lane.b32.xlu1 %v2068_v37, %s2239_s24  ;;  %v2038_v37 = vld [vmem:[#allocation7] sm:$0xff]  }
 0x92b   :  { %v2070_v40 = vpop.eup %2069 }
 0x92c   :  { %v569_v41 = vmul.f32 0.5, %v2070_v40 }
 0x92e   :  { %v570_v42 = vadd.f32 0.5, %v569_v41 }
 0x930   :  { %v572_v45 = vmul.f32 %v570_v42, %v489_v22 }
 0x99c   :  { %v575_v43 = vpop.permute.xlu1 %574 }
 0x99d   :  { %v577_v44 = vmul.f32 %v575_v43, %v570_v42 }
 0x99f   :  { %579 = vrot.lane.b32.xlu0 %v577_v44, %s2239_s24  ;;  %v204_v44 = vadd.f32 %v2387_v2, %v2343_v11 }
 0xa11   :  { %v580_v38 = vpop.permute.xlu0 %579 }
 0xa12   :  { %v582_v46 = vadd.f32 %v580_v38, %v572_v45 }
 0xa14   :  { %2071 = vtanh.f32 %v582_v46 }
 0xa21   :  { %v2072_v49 = vpop.eup %2071 }
 0xa22   :  { %585 = vrot.lane.b32.xlu1 %v2072_v49, %s2239_s24 }
 0xa94   :  { %v586_v50 = vpop.permute.xlu1 %585 }
 0xa95   :  { %v588_v51 = vmul.f32 %v586_v50, %v570_v42 }
 0xa97   :  { %v2416_v52 = vpack.c.bf16 %v588_v51, %v588_v51 }
 0xa99   :  { %602 = vrot.lane.b32.xlu0 %v2416_v52, %s2232_s22 }
 0xb0b   :  { %v603_v53 = vpop.permute.xlu0 %602 }
 0xb0c   :  { %1908 = vmatmul.mubr.msk.bf16.vlgmr.msra.gmra.mxu0 %vm238_vm3, %v603_v53 }
 0xb0d   :  { %1923 = vmatprep.mubr.msk.bf16.mxu0 %vm2238_vm0, %v2237_v1  ;;  %1920 = vmatpush3.bf16.msra.mxu0 %v2037_v35 }
 0xb0e   :  { %1921 = vmatprep.subr.bf16.mxu0 %v2237_v1 }
 0xb11   :  { %1922 = vmatpush3.bf16.msra.mxu0 %v2038_v37 }
 0xbcc   :  { %v653_v55 = vpop.f32.mrf.mxu0 }
 0xbcd   :  { %v659_v56 = vadd.f32 %v653_v55, %v196_v54 }
 0xbce   :  { %v1909_v57 = vpop.f32.mrf.mxu0 }
 0xbcf   :  { %2073 = vtanh.f32 %v659_v56  ;;  %v660_v61 = vmul.f32 0.5, %v659_v56 }
 0xbd0   :  { %v656_v58 = vpop.f32.mrf.mxu0 }
 0xbd1   :  { %2075 = vtanh.f32 %v660_v61 }
 0xbd2   :  { %v1910_v59 = vpop.f32.mrf.mxu0 }
 0xbdc   :  { %v2074_v60 = vpop.eup %2073 }
 0xbdd   :  { %667 = vrot.lane.b32.xlu1 %v2074_v60, %s2239_s24 }
 0xbde   :  { %v2076_v62 = vpop.eup %2075 }
 0xbdf   :  { %v662_v0 = vmul.f32 0.5, %v2076_v62  ;;  %v2043_v62 = vld [vmem:[#allocation7 + $0x8] sm:$0xff]  }
 0xbe1   :  { %v663_v6 = vadd.f32 0.5, %v662_v0  ;;  %v2044_v0 = vld [vmem:[#allocation7] sm:$0xff]  }
 0xbe3   :  { %v665_v9 = vmul.f32 %v663_v6, %v582_v46 }
 0xc4f   :  { %v668_v7 = vpop.permute.xlu1 %667 }
 0xc50   :  { %v670_v8 = vmul.f32 %v668_v7, %v663_v6 }
 0xc52   :  { %672 = vrot.lane.b32.xlu0 %v670_v8, %s2239_s24 }
 0xcc4   :  { %v673_v3 = vpop.permute.xlu0 %672 }
 0xcc5   :  { %v675_v12 = vadd.f32 %v673_v3, %v665_v9 }
 0xcc7   :  { %2077 = vtanh.f32 %v675_v12 }
 0xcd4   :  { %v2078_v15 = vpop.eup %2077 }
 0xcd5   :  { %678 = vrot.lane.b32.xlu1 %v2078_v15, %s2239_s24 }
 0xd47   :  { %v679_v16 = vpop.permute.xlu1 %678 }
 0xd48   :  { %v681_v17 = vmul.f32 %v679_v16, %v663_v6  ;;  %v1780_v16 = vld [vmem:[%s2640_s1 + $0x8] sm:$0xff] }
 0xd4a   :  { %v2430_v18 = vpack.c.bf16 %v681_v17, %v681_v17  ;;  %v1110_v17 = vpack.c.bf16 %v1780_v16, %v1780_v16 }
 0xd4c   :  { %695 = vrot.lane.b32.xlu0 %v2430_v18, %s2232_s22 }
 0xdbe   :  { %v696_v19 = vpop.permute.xlu0 %695 }
 0xdbf   :  { %1916 = vmatmul.mubr.msk.bf16.vlgmr.msra.gmra.mxu1 %vm238_vm3, %v696_v19  ;;  %v207_v19 = vadd.f32 %v2391_v4, %v2343_v11 }
 0xdc0   :  { %1931 = vmatprep.mubr.msk.bf16.mxu1 %vm2238_vm0, %v2237_v1  ;;  %1928 = vmatpush3.bf16.msra.mxu1 %v2043_v62 }
 0xdc1   :  { %1929 = vmatprep.subr.bf16.mxu1 %v2237_v1 }
 0xdc4   :  { %1930 = vmatpush3.bf16.msra.mxu1 %v2044_v0 }
 0xdc5   :  { %1947 = vmatprep.subr.bf16.mxu1 %v2237_v1 }
 0xe7f   :  { %v746_v21 = vpop.f32.mrf.mxu1 }
 0xe80   :  { %v752_v10 = vadd.f32 %v746_v21, %v199_v20 }
 0xe81   :  { %v1917_v22 = vpop.f32.mrf.mxu1 }
 0xe82   :  { %2079 = vtanh.f32 %v752_v10  ;;  %v753_v26 = vmul.f32 0.5, %v752_v10 }
 0xe83   :  { %v749_v23 = vpop.f32.mrf.mxu1 }
 0xe84   :  { %2081 = vtanh.f32 %v753_v26 }
 0xe85   :  { %v1918_v24 = vpop.f32.mrf.mxu1 }
 0xe8f   :  { %v2080_v25 = vpop.eup %2079 }
 0xe90   :  { %760 = vrot.lane.b32.xlu1 %v2080_v25, %s2239_s24  ;;  %v2519_v25 = vld [vmem:[%s2647_s8] ss:$0 sm:$0xff] }
 0xe91   :  { %v2082_v27 = vpop.eup %2081 }
 0xe92   :  { %v755_v29 = vmul.f32 0.5, %v2082_v27 }
 0xe94   :  { %v756_v30 = vadd.f32 0.5, %v755_v29 }
 0xe96   :  { %v758_v33 = vmul.f32 %v756_v30, %v675_v12  ;;  %v2482_v12 = vld [vmem:[#allocation10 + $0x8] sm:$0xff]  }
 0xf02   :  { %v761_v31 = vpop.permute.xlu1 %760 }
 0xf03   :  { %v763_v32 = vmul.f32 %v761_v31, %v756_v30 }
 0xf05   :  { %765 = vrot.lane.b32.xlu0 %v763_v32, %s2239_s24 }
 0xf77   :  { %v766_v5 = vpop.permute.xlu0 %765 }
 0xf78   :  { %v768_v34 = vadd.f32 %v766_v5, %v758_v33 }
 0xf7a   :  { %2083 = vtanh.f32 %v768_v34 }
 0xf87   :  { %v2084_v39 = vpop.eup %2083 }
 0xf88   :  { %771 = vrot.lane.b32.xlu1 %v2084_v39, %s2239_s24 }
 0xffa   :  { %v772_v40 = vpop.permute.xlu1 %771 }
 0xffb   :  { %v774_v41 = vmul.f32 %v772_v40, %v756_v30 }
 0xffd   :  { %v2443_v42 = vpack.c.bf16 %v774_v41, %v774_v41 }
 0xfff   :  { %788 = vrot.lane.b32.xlu0 %v2443_v42, %s2232_s22 }
0x1071   :  { %v789_v43 = vpop.permute.xlu0 %788 }
0x1072   :  { %1924 = vmatmul.mubr.msk.bf16.vlgmr.msra.gmra.mxu0 %vm238_vm3, %v789_v43 }
0x1132   :  { %v839_v45 = vpop.f32.mrf.mxu0 }
0x1133   :  { %v845_v38 = vadd.f32 %v839_v45, %v204_v44 }
0x1134   :  { %v1925_v46 = vpop.f32.mrf.mxu0 }
0x1135   :  { %2085 = vtanh.f32 %v845_v38  ;;  %v846_v50 = vmul.f32 0.5, %v845_v38 }
0x1136   :  { %v842_v47 = vpop.f32.mrf.mxu0 }
0x1137   :  { %2087 = vtanh.f32 %v846_v50 }
0x1138   :  { %v1926_v48 = vpop.f32.mrf.mxu0 }
0x1142   :  { %v2086_v49 = vpop.eup %2085 }
0x1143   :  { %853 = vrot.lane.b32.xlu1 %v2086_v49, %s2239_s24 }
0x1144   :  { %v2088_v51 = vpop.eup %2087 }
0x1145   :  { %v848_v53 = vmul.f32 0.5, %v2088_v51 }
0x1147   :  { %v849_v54 = vadd.f32 0.5, %v848_v53 }
0x1149   :  { %v851_v2 = vmul.f32 %v849_v54, %v768_v34 }
0x11b5   :  { %v854_v55 = vpop.permute.xlu1 %853 }
0x11b6   :  { %v856_v56 = vmul.f32 %v854_v55, %v849_v54 }
0x11b8   :  { %858 = vrot.lane.b32.xlu0 %v856_v56, %s2239_s24 }
0x11bc   :  { %313 = vrot.lane.b32.xlu0 %v2355_v36, %s2232_s22  ;;  %v2039_v36 = vld [vmem:[%s2645_s6 + $0x8] sm:$0xff]  }
0x11bd   :  { %1935 = vmatprep.subr.bf16.mxu0 %v2039_v36 }
0x11be   :  { %1936 = vmatpush3.bf16.msra.mxu0 %v2039_v36 }
0x11c0   :  { %500 = vrot.lane.b32.xlu0 %v2402_v28, %s2232_s22  ;;  %v2040_v28 = vld [vmem:[%s2645_s6] sm:$0xff]  }
0x11c1   :  { %1937 = vmatprep.subr.bf16.mxu0 %v2040_v28 }
0x11c2   :  { %1938 = vmatpush3.bf16.msra.mxu0 %v2040_v28 }
0x11c3   :  { %1963 = vmatprep.subr.bf16.mxu0 %v2237_v1 }
0x122a   :  { %v859_v57 = vpop.permute.xlu0 %858 }
0x122b   :  { %v2456_v58 = vadd.f32 %v859_v57, %v851_v2 }
0x122d   :  { %2089 = vtanh.f32 %v2456_v58 }
0x122e   :  { %v314_v59 = vpop.permute.xlu0 %313 }
0x122f   :  { %317 = vst.msk [vmem:[#allocation3] sm:$0xf] %vm316_vm4, %v314_v59 }
0x1232   :  { %v501_v60 = vpop.permute.xlu0 %500 }
0x1233   :  { %503 = vst.msk [vmem:[#allocation3 + $0x8] sm:$0xf] %vm316_vm4, %v501_v60 }
0x123a   :  { %v2090_v61 = vpop.eup %2089 }
0x123b   :  { %864 = vrot.lane.b32.xlu1 %v2090_v61, %s2239_s24 }
0x123f   :  { %407 = vrot.lane.b32.xlu1 %v2380_v63, %s2232_s22 }
0x1243   :  { %593 = vrot.lane.b32.xlu1 %v2416_v52, %s2232_s22 }
0x12ad   :  { %v865_v6 = vpop.permute.xlu1 %864 }
0x12ae   :  { %v867_v7 = vmul.f32 %v865_v6, %v849_v54 }
0x12b0   :  { %v2475_v8 = vpack.c.bf16 %v867_v7, %v867_v7 }
0x12b1   :  { %v408_v9 = vpop.permute.xlu1 %407 }
0x12b2   :  { %410 = vst.msk [vmem:[#allocation3 + $0x4] sm:$0xf] %vm316_vm4, %v408_v9  ;;  %881 = vrot.lane.b32.xlu0 %v2475_v8, %s2232_s22 }
0x12b5   :  { %v594_v63 = vpop.permute.xlu1 %593 }
0x12b6   :  { %596 = vst.msk [vmem:[#allocation3 + $0xc] sm:$0xf] %vm316_vm4, %v594_v63  ;;  %1177 = vrot.lane.b32.xlu0 %v1781_v14, %s2239_s24 }
0x12b9   :  { %v2041_v3 = vld [vmem:[#allocation3] sm:$0xff]  }
0x12ba   :  { %1939 = vmatprep.mubr.msk.bf16.mxu0 %vm238_vm3, %v2041_v3 }
0x12bd   :  { %v2042_v52 = vld [vmem:[#allocation3 + $0x8] sm:$0xff]  }
0x12be   :  { %1940 = vmatmul.mubr.msk.bf16.vlgmr.msra.gmra.mxu0 %vm238_vm3, %v2042_v52 }
0x12bf   :  { %1964 = vmatpush3.bf16.msra.mxu0 %v2482_v12 }
0x12c0   :  { %1965 = vmatprep.subr.bf16.mxu0 %v2237_v1 }
0x12c3   :  { %1966 = vmatpush3.bf16.msra.mxu0 %v2487_v13 }
0x12c4   :  { %1979 = vmatprep.subr.bf16.mxu0 %v2237_v1 }
0x1324   :  { %v882_v15 = vpop.permute.xlu0 %881 }
0x1325   :  { %1932 = vmatmul.mubr.msk.bf16.vlgmr.msra.gmra.mxu1 %vm238_vm3, %v882_v15 }
0x1326   :  { %1948 = vmatpush3.bf16.msra.mxu1 %v2482_v12  ;;  %1951 = vmatprep.mubr.msk.bf16.mxu1 %vm2238_vm0, %v2237_v1 }
0x1327   :  { %1949 = vmatprep.subr.bf16.mxu1 %v2237_v1 }
0x1328   :  { %v1178_v40 = vpop.permute.xlu0 %1177 }
0x132a   :  { %1950 = vmatpush3.bf16.msra.mxu1 %v2487_v13 }
0x132b   :  { %1955 = vmatprep.subr.bf16.mxu1 %v2237_v1 }
0x132d   :  { %1952 = vmatmul.mubr.msk.bf16.vlgmr.msra.gmra.mxu1 %vm238_vm3, %v1110_v17 }
0x132e   :  { %1956 = vmatpush3.bf16.msra.mxu1 %v2482_v12  ;;  %1959 = vmatprep.mubr.msk.bf16.mxu1 %vm2238_vm0, %v2237_v1 }
0x132f   :  { %1957 = vmatprep.subr.bf16.mxu1 %v2237_v1 }
0x1332   :  { %1958 = vmatpush3.bf16.msra.mxu1 %v2487_v13 }
0x1333   :  { %1971 = vmatprep.subr.bf16.mxu1 %v2237_v1 }
0x137e   :  { %v2514_v20 = vpop.f32.mrf.mxu0 }
0x1380   :  { %v1066_v23 = vpop.f32.mrf.mxu0 }
0x1381   :  { %v1067_v27 = vadd.f32 %v2519_v25, %v1066_v23 }
0x1382   :  { %v2543_v61 = vpop.f32.mrf.mxu0 }
0x1384   :  { %v1069_v62 = vpop.f32.mrf.mxu0 }
0x1385   :  { %v1070_v0 = vadd.f32 %v2519_v25, %v1069_v62 }
0x13e5   :  { %v932_v21 = vpop.f32.mrf.mxu1 }
0x13e6   :  { %v938_v10 = vadd.f32 %v932_v21, %v207_v19 }
0x13e7   :  { %v1933_v22 = vpop.f32.mrf.mxu1 }
0x13e8   :  { %v939_v46 = vmul.f32 0.5, %v938_v10 }
0x13e9   :  { %v935_v24 = vpop.f32.mrf.mxu1 }
0x13eb   :  { %v1934_v26 = vpop.f32.mrf.mxu1 }
0x13ed   :  { %v1164_v29 = vpop.f32.mrf.mxu1 }
0x13ee   :  { %v1170_v30 = vadd.f32 %v1164_v29, %v1067_v27 }
0x13ef   :  { %v1953_v31 = vpop.f32.mrf.mxu1 }
0x13f0   :  { %2091 = vtanh.f32 %v1170_v30  ;;  %v1171_v33 = vmul.f32 0.5, %v1170_v30 }
0x13f1   :  { %v1167_v11 = vpop.f32.mrf.mxu1 }
0x13f2   :  { %2093 = vtanh.f32 %v1171_v33 }
0x13f3   :  { %v1954_v4 = vpop.f32.mrf.mxu1 }
0x13fd   :  { %v2092_v32 = vpop.eup %2091 }
0x13fe   :  { %1182 = vrot.lane.b32.xlu1 %v2092_v32, %s2239_s24 }
0x13ff   :  { %v2094_v5 = vpop.eup %2093 }
0x1400   :  { %v1173_v34 = vmul.f32 0.5, %v2094_v5 }
0x1402   :  { %v1174_v35 = vadd.f32 0.5, %v1173_v34 }
0x1404   :  { %v1180_v41 = vmul.f32 %v1178_v40, %v1174_v35 }
0x1470   :  { %v1183_v37 = vpop.permute.xlu1 %1182 }
0x1471   :  { %v1185_v39 = vmul.f32 %v1183_v37, %v1174_v35 }
0x1473   :  { %1187 = vrot.lane.b32.xlu1 %v1185_v39, %s2239_s24 }
0x14e5   :  { %v1188_v43 = vpop.permute.xlu1 %1187 }
0x14e6   :  { %v1190_v44 = vadd.f32 %v1188_v43, %v1180_v41 }
0x14e8   :  { %2095 = vtanh.f32 %v1190_v44 }
0x14e9   :  { %2097 = vtanh.f32 %v938_v10 }
0x14ea   :  { %2099 = vtanh.f32 %v939_v46 }
0x14f5   :  { %v2096_v45 = vpop.eup %2095 }
0x14f6   :  { %1193 = vrot.lane.b32.xlu0 %v2096_v45, %s2239_s24  ;;  %v2098_v38 = vpop.eup %2097 }
0x14f7   :  { %v2100_v47 = vpop.eup %2099 }
0x14f8   :  { %v941_v48 = vmul.f32 0.5, %v2100_v47 }
0x14fa   :  { %946 = vrot.lane.b32.xlu0 %v2098_v38, %s2239_s24  ;;  %v942_v53 = vadd.f32 0.5, %v941_v48 }
0x14fc   :  { %v944_v2 = vmul.f32 %v942_v53, %v2456_v58 }
0x1568   :  { %v1194_v49 = vpop.permute.xlu0 %1193 }
0x1569   :  { %v1196_v50 = vmul.f32 %v1194_v49, %v1174_v35  ;;  %v1075_v35 = vadd.f32 %v2514_v20, %v2519_v25 }
0x156b   :  { %v1198_v51 = vpack.c.bf16 %v1196_v50, %v1196_v50 }
0x156c   :  { %v947_v54 = vpop.permute.xlu0 %946 }
0x156d   :  { %v949_v55 = vmul.f32 %v947_v54, %v942_v53  ;;  %1200 = vrot.lane.b32.xlu1 %v1198_v51, %s2232_s22 }
0x156f   :  { %951 = vrot.lane.b32.xlu0 %v949_v55, %s2239_s24 }
0x15df   :  { %v1201_v56 = vpop.permute.xlu1 %1200 }
0x15e0   :  { %1960 = vmatmul.mubr.msk.bf16.vlgmr.msra.gmra.mxu1 %vm238_vm3, %v1201_v56 }
0x15e1   :  { %v952_v57 = vpop.permute.xlu0 %951  ;;  %1972 = vmatpush3.bf16.msra.mxu1 %v2482_v12  ;;  %1975 = vmatprep.mubr.msk.bf16.mxu1 %vm2238_vm0, %v2237_v1 }
0x15e2   :  { %v954_v59 = vadd.f32 %v952_v57, %v944_v2  ;;  %1973 = vmatprep.subr.bf16.mxu1 %v2237_v1  ;;  %v1078_v57 = vadd.f32 %v2543_v61, %v2519_v25 }
0x15e4   :  { %2101 = vtanh.f32 %v954_v59 }
0x15e5   :  { %1974 = vmatpush3.bf16.msra.mxu1 %v2487_v13 }
0x15e6   :  { %1987 = vmatprep.subr.bf16.mxu1 %v2237_v1 }
0x15f1   :  { %v2102_v60 = vpop.eup %2101 }
0x15f2   :  { %957 = vrot.lane.b32.xlu0 %v2102_v60, %s2239_s24 }
0x15f6   :  { %686 = vrot.lane.b32.xlu0 %v2430_v18, %s2232_s22 }
0x15fa   :  { %872 = vrot.lane.b32.xlu0 %v2475_v8, %s2232_s22 }
0x1664   :  { %v958_v58 = vpop.permute.xlu0 %957 }
0x1665   :  { %v960_v23 = vmul.f32 %v958_v58, %v942_v53 }
0x1667   :  { %v1801_v24 = vpack.c.bf16 %v960_v23, %v960_v23 }
0x1668   :  { %v687_v36 = vpop.permute.xlu0 %686 }
0x1669   :  { %689 = vst.msk [vmem:[#allocation3 + $0x10] sm:$0xf] %vm316_vm4, %v687_v36 }
0x166c   :  { %v873_v28 = vpop.permute.xlu0 %872 }
0x166d   :  { %875 = vst.msk [vmem:[#allocation3 + $0x18] sm:$0xf] %vm316_vm4, %v873_v28 }
0x16a0   :  { %v1239_v6 = vpop.f32.mrf.mxu1 }
0x16a1   :  { %v1245_v7 = vadd.f32 %v1239_v6, %v1070_v0 }
0x16a2   :  { %v1961_v9 = vpop.f32.mrf.mxu1 }
0x16a3   :  { %2103 = vtanh.f32 %v1245_v7  ;;  %v1246_v8 = vmul.f32 0.5, %v1245_v7 }
0x16a4   :  { %v1242_v18 = vpop.f32.mrf.mxu1 }
0x16a5   :  { %2105 = vtanh.f32 %v1246_v8 }
0x16a6   :  { %v1962_v63 = vpop.f32.mrf.mxu1 }
0x16b0   :  { %v2104_v3 = vpop.eup %2103 }
0x16b1   :  { %1253 = vrot.lane.b32.xlu1 %v2104_v3, %s2239_s24 }
0x16b2   :  { %v2106_v52 = vpop.eup %2105 }
0x16b3   :  { %v1248_v14 = vmul.f32 0.5, %v2106_v52 }
0x16b5   :  { %v1249_v15 = vadd.f32 0.5, %v1248_v14 }
0x16b7   :  { %v1251_v19 = vmul.f32 %v1249_v15, %v1190_v44 }
0x1723   :  { %v1254_v16 = vpop.permute.xlu1 %1253 }
0x1724   :  { %v1256_v17 = vmul.f32 %v1254_v16, %v1249_v15 }
0x1726   :  { %1258 = vrot.lane.b32.xlu1 %v1256_v17, %s2239_s24 }
0x1798   :  { %v1259_v21 = vpop.permute.xlu1 %1258 }
0x1799   :  { %v1261_v10 = vadd.f32 %v1259_v21, %v1251_v19 }
0x179b   :  { %2107 = vtanh.f32 %v1261_v10 }
0x17a8   :  { %v2108_v22 = vpop.eup %2107 }
0x17a9   :  { %1264 = vrot.lane.b32.xlu1 %v2108_v22, %s2239_s24 }
0x17ad   :  { %779 = vrot.lane.b32.xlu1 %v2443_v42, %s2232_s22 }
0x17b1   :  { %965 = vrot.lane.b32.xlu1 %v1801_v24, %s2232_s22 }
0x181b   :  { %v1265_v26 = vpop.permute.xlu1 %1264 }
0x181c   :  { %v1267_v27 = vmul.f32 %v1265_v26, %v1249_v15 }
0x181e   :  { %v1269_v29 = vpack.c.bf16 %v1267_v27, %v1267_v27 }
0x181f   :  { %v780_v30 = vpop.permute.xlu1 %779 }
0x1820   :  { %782 = vst.msk [vmem:[#allocation3 + $0x14] sm:$0xf] %vm316_vm4, %v780_v30  ;;  %1271 = vrot.lane.b32.xlu0 %v1269_v29, %s2232_s22 }
0x1823   :  { %v966_v31 = vpop.permute.xlu1 %965 }
0x1824   :  { %968 = vst.msk [vmem:[#allocation3 + $0x1c] sm:$0xf] %vm316_vm4, %v966_v31 }
0x1827   :  { %v2047_v11 = vld [vmem:[#allocation3 + $0x10] sm:$0xff]  }
0x1828   :  { %1943 = vmatprep.mubr.msk.bf16.mxu0 %vm238_vm3, %v2047_v11 }
0x182b   :  { %v2048_v4 = vld [vmem:[#allocation3 + $0x18] sm:$0xff]  }
0x182c   :  { %1944 = vmatmul.mubr.msk.bf16.gmra.mxu0 %vm238_vm3, %v2048_v4 }
0x182d   :  { %1967 = vmatprep.mubr.msk.bf16.mxu0 %vm2238_vm0, %v2237_v1 }
0x1892   :  { %v1272_v42 = vpop.permute.xlu0 %1271 }
0x1893   :  { %1968 = vmatmul.mubr.msk.bf16.vlgmr.msra.gmra.mxu0 %vm238_vm3, %v1272_v42 }
0x1894   :  { %1980 = vmatpush3.bf16.msra.mxu0 %v2482_v12  ;;  %1983 = vmatprep.mubr.msk.bf16.mxu0 %vm2238_vm0, %v2237_v1 }
0x1895   :  { %1981 = vmatprep.subr.bf16.mxu0 %v2237_v1 }
0x1898   :  { %1982 = vmatpush3.bf16.msra.mxu0 %v2487_v13 }
0x1899   :  { %1995 = vmatprep.subr.bf16.mxu0 %v2237_v1 }
0x18ec   :  { %v2566_v32 = vpop.f32.mrf.mxu0 }
0x18ee   :  { %v2568_v33 = vpop.f32.mrf.mxu0 }
0x18ef   :  { %v1083_v19 = vadd.f32 %v2519_v25, %v2568_v33 }
0x18f0   :  { %v2570_v5 = vpop.f32.mrf.mxu0 }
0x18f2   :  { %v2572_v34 = vpop.f32.mrf.mxu0 }
0x1953   :  { %v1310_v37 = vpop.f32.mrf.mxu0 }
0x1954   :  { %v1316_v39 = vadd.f32 %v1310_v37, %v1075_v35 }
0x1955   :  { %v1969_v40 = vpop.f32.mrf.mxu0 }
0x1956   :  { %2109 = vtanh.f32 %v1316_v39  ;;  %v1317_v45 = vmul.f32 0.5, %v1316_v39 }
0x1957   :  { %v1313_v41 = vpop.f32.mrf.mxu0 }
0x1958   :  { %2111 = vtanh.f32 %v1317_v45 }
0x1959   :  { %v1970_v43 = vpop.f32.mrf.mxu0 }
0x1963   :  { %v2110_v44 = vpop.eup %2109 }
0x1964   :  { %1324 = vrot.lane.b32.xlu1 %v2110_v44, %s2239_s24  ;;  %v1086_v44 = vadd.f32 %v2519_v25, %v2572_v34 }
0x1965   :  { %v2112_v38 = vpop.eup %2111 }
0x1966   :  { %v1319_v46 = vmul.f32 0.5, %v2112_v38 }
0x1968   :  { %v1320_v47 = vadd.f32 0.5, %v1319_v46 }
0x196a   :  { %v1322_v50 = vmul.f32 %v1320_v47, %v1261_v10 }
0x19d6   :  { %v1325_v48 = vpop.permute.xlu1 %1324 }
0x19d7   :  { %v1327_v49 = vmul.f32 %v1325_v48, %v1320_v47 }
0x19d9   :  { %1329 = vrot.lane.b32.xlu0 %v1327_v49, %s2239_s24 }
0x1a4b   :  { %v1330_v20 = vpop.permute.xlu0 %1329 }
0x1a4c   :  { %v1332_v51 = vadd.f32 %v1330_v20, %v1322_v50 }
0x1a4e   :  { %2113 = vtanh.f32 %v1332_v51 }
0x1a5b   :  { %v2114_v53 = vpop.eup %2113 }
0x1a5c   :  { %1335 = vrot.lane.b32.xlu1 %v2114_v53, %s2239_s24 }
0x1ace   :  { %v1336_v54 = vpop.permute.xlu1 %1335 }
0x1acf   :  { %v1338_v55 = vmul.f32 %v1336_v54, %v1320_v47 }
0x1ad1   :  { %v1340_v56 = vpack.c.bf16 %v1338_v55, %v1338_v55 }
0x1ad3   :  { %1342 = vrot.lane.b32.xlu0 %v1340_v56, %s2232_s22 }
0x1b45   :  { %v1343_v2 = vpop.permute.xlu0 %1342 }
0x1b46   :  { %1976 = vmatmul.mubr.msk.bf16.vlgmr.msra.gmra.mxu1 %vm238_vm3, %v1343_v2 }
0x1b47   :  { %1988 = vmatpush3.bf16.msra.mxu1 %v2482_v12  ;;  %1991 = vmatprep.mubr.msk.bf16.mxu1 %vm2238_vm0, %v2237_v1 }
0x1b48   :  { %1989 = vmatprep.subr.bf16.mxu1 %v2237_v1 }
0x1b4b   :  { %1990 = vmatpush3.bf16.msra.mxu1 %v2487_v13 }
0x1b4c   :  { %2003 = vmatprep.subr.bf16.mxu1 %v2237_v1 }
0x1c06   :  { %v1381_v59 = vpop.f32.mrf.mxu1 }
0x1c07   :  { %v1387_v60 = vadd.f32 %v1381_v59, %v1078_v57 }
0x1c08   :  { %v1977_v58 = vpop.f32.mrf.mxu1 }
0x1c09   :  { %2115 = vtanh.f32 %v1387_v60  ;;  %v1388_v0 = vmul.f32 0.5, %v1387_v60  ;;  %v1091_v60 = vadd.f32 %v2566_v32, %v2519_v25 }
0x1c0a   :  { %v1384_v36 = vpop.f32.mrf.mxu1 }
0x1c0b   :  { %2117 = vtanh.f32 %v1388_v0 }
0x1c0c   :  { %v1978_v28 = vpop.f32.mrf.mxu1 }
0x1c16   :  { %v2116_v62 = vpop.eup %2115 }
0x1c17   :  { %1395 = vrot.lane.b32.xlu1 %v2116_v62, %s2239_s24 }
0x1c18   :  { %v2118_v6 = vpop.eup %2117 }
0x1c19   :  { %v1390_v7 = vmul.f32 0.5, %v2118_v6 }
0x1c1b   :  { %v1391_v9 = vadd.f32 0.5, %v1390_v7 }
0x1c1d   :  { %v1393_v3 = vmul.f32 %v1391_v9, %v1332_v51 }
0x1c89   :  { %v1396_v18 = vpop.permute.xlu1 %1395 }
0x1c8a   :  { %v1398_v63 = vmul.f32 %v1396_v18, %v1391_v9 }
0x1c8c   :  { %1400 = vrot.lane.b32.xlu0 %v1398_v63, %s2239_s24 }
0x1cfe   :  { %v1401_v61 = vpop.permute.xlu0 %1400 }
0x1cff   :  { %v1403_v8 = vadd.f32 %v1401_v61, %v1393_v3 }
0x1d01   :  { %2119 = vtanh.f32 %v1403_v8 }
0x1d0e   :  { %v2120_v52 = vpop.eup %2119 }
0x1d0f   :  { %1406 = vrot.lane.b32.xlu1 %v2120_v52, %s2239_s24 }
0x1d81   :  { %v1407_v14 = vpop.permute.xlu1 %1406 }
0x1d82   :  { %v1409_v15 = vmul.f32 %v1407_v14, %v1391_v9 }
0x1d84   :  { %v1411_v16 = vpack.c.bf16 %v1409_v15, %v1409_v15 }
0x1d86   :  { %1413 = vrot.lane.b32.xlu0 %v1411_v16, %s2232_s22 }
0x1df8   :  { %v1414_v17 = vpop.permute.xlu0 %1413 }
0x1df9   :  { %1984 = vmatmul.mubr.msk.bf16.vlgmr.msra.gmra.mxu0 %vm238_vm3, %v1414_v17 }
0x1dfa   :  { %1996 = vmatpush3.bf16.msra.mxu0 %v2482_v12  ;;  %1999 = vmatprep.mubr.msk.bf16.mxu0 %vm2238_vm0, %v2237_v1 }
0x1dfb   :  { %1997 = vmatprep.subr.bf16.mxu0 %v2237_v1 }
0x1dfe   :  { %1998 = vmatpush3.bf16.msra.mxu0 %v2487_v13 }
0x1eb9   :  { %v1452_v21 = vpop.f32.mrf.mxu0 }
0x1eba   :  { %v1458_v10 = vadd.f32 %v1452_v21, %v1083_v19  ;;  %v1094_v21 = vadd.f32 %v2570_v5, %v2519_v25  ;;  %v1792_v25 = vld [vmem:[%s2648_s9] ss:$0 sm:$0xff] }
0x1ebb   :  { %v1985_v22 = vpop.f32.mrf.mxu0 }
0x1ebc   :  { %2121 = vtanh.f32 %v1458_v10  ;;  %v1459_v27 = vmul.f32 0.5, %v1458_v10 }
0x1ebd   :  { %v1455_v23 = vpop.f32.mrf.mxu0 }
0x1ebe   :  { %2123 = vtanh.f32 %v1459_v27 }
0x1ebf   :  { %v1986_v24 = vpop.f32.mrf.mxu0 }
0x1ec9   :  { %v2122_v26 = vpop.eup %2121 }
0x1eca   :  { %1466 = vrot.lane.b32.xlu1 %v2122_v26, %s2239_s24 }
0x1ecb   :  { %v2124_v29 = vpop.eup %2123 }
0x1ecc   :  { %v1461_v30 = vmul.f32 0.5, %v2124_v29 }
0x1ece   :  { %v1462_v31 = vadd.f32 0.5, %v1461_v30 }
0x1ed0   :  { %v1464_v42 = vmul.f32 %v1462_v31, %v1403_v8 }
0x1f3c   :  { %v1467_v11 = vpop.permute.xlu1 %1466 }
0x1f3d   :  { %v1469_v4 = vmul.f32 %v1467_v11, %v1462_v31 }
0x1f3f   :  { %1471 = vrot.lane.b32.xlu0 %v1469_v4, %s2239_s24 }
0x1fb1   :  { %v1472_v33 = vpop.permute.xlu0 %1471 }
0x1fb2   :  { %v1474_v35 = vadd.f32 %v1472_v33, %v1464_v42 }
0x1fb4   :  { %2125 = vtanh.f32 %v1474_v35 }
0x1fc1   :  { %v2126_v37 = vpop.eup %2125 }
0x1fc2   :  { %1477 = vrot.lane.b32.xlu1 %v2126_v37, %s2239_s24 }
0x2034   :  { %v1478_v39 = vpop.permute.xlu1 %1477 }
0x2035   :  { %v1480_v40 = vmul.f32 %v1478_v39, %v1462_v31 }
0x2037   :  { %v1482_v41 = vpack.c.bf16 %v1480_v40, %v1480_v40 }
0x2039   :  { %1484 = vrot.lane.b32.xlu0 %v1482_v41, %s2232_s22 }
0x20ab   :  { %v1485_v43 = vpop.permute.xlu0 %1484 }
0x20ac   :  { %1992 = vmatmul.mubr.msk.bf16.vlgmr.msra.gmra.mxu1 %vm238_vm3, %v1485_v43 }
0x20ad   :  { %2004 = vmatpush3.bf16.msra.mxu1 %v2482_v12  ;;  %2007 = vmatprep.mubr.msk.bf16.mxu1 %vm2238_vm0, %v2237_v1 }
0x20ae   :  { %2005 = vmatprep.subr.bf16.mxu1 %v2237_v1 }
0x20b1   :  { %2006 = vmatpush3.bf16.msra.mxu1 %v2487_v13 }
0x216c   :  { %v1523_v45 = vpop.f32.mrf.mxu1 }
0x216d   :  { %v1529_v38 = vadd.f32 %v1523_v45, %v1086_v44 }
0x216e   :  { %v1993_v46 = vpop.f32.mrf.mxu1 }
0x216f   :  { %2127 = vtanh.f32 %v1529_v38  ;;  %v1530_v12 = vmul.f32 0.5, %v1529_v38  ;;  %v1793_v38 = vld [vmem:[#allocation4] ss:$0 sm:$0xff] }
0x2170   :  { %v1526_v47 = vpop.f32.mrf.mxu1 }
0x2171   :  { %2129 = vtanh.f32 %v1530_v12 }
0x2172   :  { %v1994_v48 = vpop.f32.mrf.mxu1 }
0x217c   :  { %v2128_v49 = vpop.eup %2127 }
0x217d   :  { %1537 = vrot.lane.b32.xlu1 %v2128_v49, %s2239_s24 }
0x217e   :  { %v2130_v50 = vpop.eup %2129 }
0x217f   :  { %v1532_v20 = vmul.f32 0.5, %v2130_v50 }
0x2181   :  { %v1533_v51 = vadd.f32 0.5, %v1532_v20 }
0x2183   :  { %v1535_v13 = vmul.f32 %v1533_v51, %v1474_v35 }
0x21ef   :  { %v1538_v1 = vpop.permute.xlu1 %1537 }
0x21f0   :  { %v1540_v53 = vmul.f32 %v1538_v1, %v1533_v51 }
0x21f2   :  { %1542 = vrot.lane.b32.xlu0 %v1540_v53, %s2239_s24 }
0x2264   :  { %v1543_v34 = vpop.permute.xlu0 %1542 }
0x2265   :  { %v1545_v54 = vadd.f32 %v1543_v34, %v1535_v13 }
0x2267   :  { %2131 = vtanh.f32 %v1545_v54 }
0x2274   :  { %v2132_v55 = vpop.eup %2131 }
0x2275   :  { %1548 = vrot.lane.b32.xlu1 %v2132_v55, %s2239_s24 }
0x22e7   :  { %v1549_v56 = vpop.permute.xlu1 %1548 }
0x22e8   :  { %v1551_v2 = vmul.f32 %v1549_v56, %v1533_v51 }
0x22ea   :  { %v1553_v57 = vpack.c.bf16 %v1551_v2, %v1551_v2 }
0x22ec   :  { %1555 = vrot.lane.b32.xlu0 %v1553_v57, %s2232_s22 }
0x235e   :  { %v1556_v59 = vpop.permute.xlu0 %1555 }
0x235f   :  { %2000 = vmatmul.mubr.msk.bf16.vlgmr.msra.gmra.mxu0 %vm238_vm3, %v1556_v59 }
0x241f   :  { %v1594_v58 = vpop.f32.mrf.mxu0 }
0x2420   :  { %v1600_v36 = vadd.f32 %v1594_v58, %v1091_v60 }
0x2421   :  { %v2001_v28 = vpop.f32.mrf.mxu0 }
0x2422   :  { %2133 = vtanh.f32 %v1600_v36  ;;  %v1601_v7 = vmul.f32 0.5, %v1600_v36 }
0x2423   :  { %v1597_v62 = vpop.f32.mrf.mxu0 }
0x2424   :  { %2135 = vtanh.f32 %v1601_v7 }
0x2425   :  { %v2002_v0 = vpop.f32.mrf.mxu0 }
0x242f   :  { %v2134_v6 = vpop.eup %2133 }
0x2430   :  { %1608 = vrot.lane.b32.xlu1 %v2134_v6, %s2239_s24 }
0x2431   :  { %v2136_v9 = vpop.eup %2135 }
0x2432   :  { %v1603_v18 = vmul.f32 0.5, %v2136_v9 }
0x2434   :  { %v1604_v63 = vadd.f32 0.5, %v1603_v18 }
0x2436   :  { %v1606_v8 = vmul.f32 %v1604_v63, %v1545_v54 }
0x24a2   :  { %v1609_v3 = vpop.permute.xlu1 %1608 }
0x24a3   :  { %v1611_v61 = vmul.f32 %v1609_v3, %v1604_v63 }
0x24a5   :  { %1613 = vrot.lane.b32.xlu0 %v1611_v61, %s2239_s24 }
0x2517   :  { %v1614_v32 = vpop.permute.xlu0 %1613 }
0x2518   :  { %v1616_v52 = vadd.f32 %v1614_v32, %v1606_v8 }
0x251a   :  { %2137 = vtanh.f32 %v1616_v52 }
0x2527   :  { %v2138_v14 = vpop.eup %2137 }
0x2528   :  { %1619 = vrot.lane.b32.xlu1 %v2138_v14, %s2239_s24 }
0x259a   :  { %v1620_v15 = vpop.permute.xlu1 %1619 }
0x259b   :  { %v1622_v16 = vmul.f32 %v1620_v15, %v1604_v63 }
0x259d   :  { %v1624_v17 = vpack.c.bf16 %v1622_v16, %v1622_v16 }
0x259f   :  { %1626 = vrot.lane.b32.xlu0 %v1624_v17, %s2232_s22 }
0x2611   :  { %v1627_v19 = vpop.permute.xlu0 %1626 }
0x2612   :  { %2008 = vmatmul.mubr.msk.bf16.vlgmr.msra.gmra.mxu1 %vm238_vm3, %v1627_v19 }
0x26d2   :  { %v1665_v10 = vpop.f32.mrf.mxu1 }
0x26d3   :  { %v1671_v22 = vadd.f32 %v1665_v10, %v1094_v21 }
0x26d4   :  { %v2009_v23 = vpop.f32.mrf.mxu1 }
0x26d5   :  { %2139 = vtanh.f32 %v1671_v22  ;;  %v1672_v29 = vmul.f32 0.5, %v1671_v22 }
0x26d6   :  { %v1668_v24 = vpop.f32.mrf.mxu1 }
0x26d7   :  { %2141 = vtanh.f32 %v1672_v29 }
0x26d8   :  { %v2010_v26 = vpop.f32.mrf.mxu1 }
0x26e2   :  { %v2140_v27 = vpop.eup %2139 }
0x26e3   :  { %1679 = vrot.lane.b32.xlu1 %v2140_v27, %s2239_s24 }
0x26e4   :  { %v2142_v30 = vpop.eup %2141 }
0x26e5   :  { %v1674_v31 = vmul.f32 0.5, %v2142_v30 }
0x26e7   :  { %v1675_v11 = vadd.f32 0.5, %v1674_v31 }
0x26e9   :  { %v1677_v5 = vmul.f32 %v1675_v11, %v1616_v52 }
0x2755   :  { %v1680_v4 = vpop.permute.xlu1 %1679 }
0x2756   :  { %v1682_v42 = vmul.f32 %v1680_v4, %v1675_v11 }
0x2758   :  { %1684 = vrot.lane.b32.xlu0 %v1682_v42, %s2239_s24 }
0x275c   :  { %1700 = vrot.lane.b32.xlu0 %v1792_v25, %s2232_s22 }
0x27ca   :  { %v1685_v33 = vpop.permute.xlu0 %1684 }
0x27cb   :  { %v1687_v35 = vadd.f32 %v1685_v33, %v1677_v5 }
0x27cd   :  { %2143 = vtanh.f32 %v1687_v35 }
0x27ce   :  { %v1701_v40 = vpop.permute.xlu0 %1700 }
0x27da   :  { %v2144_v37 = vpop.eup %2143 }
0x27db   :  { %1690 = vrot.lane.b32.xlu1 %v2144_v37, %s2239_s24 }
0x284d   :  { %v1691_v39 = vpop.permute.xlu1 %1690 }
0x284e   :  { %v1693_v41 = vmul.f32 %v1691_v39, %v1675_v11 }
0x2850   :  { %v1703_v43 = vmul.f32 %v1701_v40, %v1693_v41 }
0x2852   :  { %1705 = vrot.lane.b32.xlu1 %v1703_v43, %s2232_s22 }
0x28c4   :  { %v1706_v44 = vpop.permute.xlu1 %1705 }
0x28c5   :  { %v1708_v45 = vsel %vm238_vm3, %v1706_v44, 0.0 }
0x28c6   :  { %1709 = vadd.xlane.f32.xlu0 %v1708_v45 }
0x294f   :  { %v1710_v46 = vpop.xlane.xlu0 %1709 }
0x2950   :  { %v1718_v47 = vadd.f32 %v1793_v38, %v1710_v46 }
0x2952   :  { %1720 = vst.msk [vmem:[%s2650_s11] sm:$0xff] %vm1719_vm5, %v1718_v47 }
0x2953   :  { %1725 = vsyncpa [#allocation6], 1 }
0x2954   :  { %1726 = vsyncpa [#allocation8], 1 }
0x2955   :  { %1727 = vsyncpa [#allocation11], 1 }

</bundles_post_ra>
